<compile_context>
chip_gen: v7x
topology: tpu7x:2x2x1
jax: 0.10.0
libtpu: 0.0.40
codegen_flags: <defaults>
</compile_context>

<pallas_src>
import functools

import numpy as np
import jax
import jax.numpy as jnp
from jax import lax
from jax.experimental import pallas as pl
from jax.experimental.pallas import tpu as pltpu


# ---------------------------------------------------------------------------
# Pallas kernel: 3x3 conv + fused cls/box heads + proposal decode + clip
# ---------------------------------------------------------------------------
def rpn_fused_kernel(x2d_ref, w1_ref, b1_ref, whead_ref, bhead_ref,
                     anchors_ref, out_ref, *, fw, tr, c, img_h, img_w):
    # x2d_ref:     ((FH+2)*FW, 3C) bf16  column-im2col slab, VMEM-resident
    # w1_ref:      (9C, C)  bf16   3x3 conv weight, (ky, kx, Cin)-major on K
    # b1_ref:      (1, C)   f32
    # whead_ref:   (C, 256) bf16   fused cls/box head (see module docstring)
    # bhead_ref:   (1, 256) f32
    # anchors_ref: (TM, 256) f32   [size-lanes | ctr-lanes], aligned at 45:81
    # out_ref:     (TM, 128) f32
    tm = tr * fw
    i = pl.program_id(0)

    # --- 3x3 "same" conv as three K=3C MXU matmuls over row-shifted slabs ---
    acc = jnp.zeros((tm, c), jnp.float32)
    for ky in range(3):                                   # static, unrolled
        start = pl.multiple_of((i * tr + ky) * fw, 8)     # sublane-aligned
        slab = x2d_ref[pl.ds(start, tm), :]               # (tm, 3C) bf16
        wk = w1_ref[ky * 3 * c:(ky + 1) * 3 * c, :]       # (3C, C)  bf16
        acc = acc + jnp.dot(slab, wk, preferred_element_type=jnp.float32)
    y = jnp.maximum(acc + b1_ref[...], 0.0)               # bias + ReLU (f32)

    # --- fused cls + box heads: one (tm, C) @ (C, 256) matmul ---
    head = jnp.dot(y.astype(jnp.bfloat16), whead_ref[...],
                   preferred_element_type=jnp.float32) + bhead_ref[...]
    head_a = head[:, 0:128]     # [cls | deltas a-major | ty|tx|th|tw | pad]
    head_b = head[:, 128:256]   # [pad(45)             | th|tw|ty|tx | pad]

    a = anchors_ref[...]
    a_size = a[:, 0:128]        # [ah|aw|ah|aw] at lanes 45:81, 0 elsewhere
    a_ctr = a[:, 128:256]       # [cy|cx|cy|cx] at lanes 45:81, 0 elsewhere

    lane = lax.broadcasted_iota(jnp.int32, (tm, 128), 1)
    lane2 = lax.broadcasted_iota(jnp.int32, (tm, 256), 1)

    # One EUP exp pass: -cls on lanes 0:9, th|tw on lanes 63:81 (vreg A) and
    # lanes 45:63 of vreg B; everything else exp(0)=1 and masked out later.
    sgn = jnp.where(lane2 < 9, -1.0,
          jnp.where((lane2 >= 63) & (lane2 < 81), 1.0,
          jnp.where((lane2 >= 128 + 45) & (lane2 < 128 + 63), 1.0, 0.0)))
    e = jnp.exp(head * sgn)
    e_a = e[:, 0:128]
    e_b = e[:, 128:256]

    sig = 1.0 / (1.0 + e_a)                 # exact sigmoid, valid on lanes 0:9

    # Box decode (repo convention, no delta clamp — matches the reference):
    #   ctr = a_size * t_ctr + a_ctr ; size = a_size * exp(t_size)
    size_a = a_size * e_a                   # lanes 63:81 -> [hh | ww]
    size_b = a_size * e_b                   # lanes 45:63 -> [hh | ww]
    ctr_a = a_size * head_a + a_ctr         # lanes 45:63 -> [ctr_y | ctr_x]
    ctr_b = a_size * head_b + a_ctr         # lanes 63:81 -> [ctr_y | ctr_x]

    clipmax = jnp.where(lane < 72, img_h, img_w)
    lo = jnp.maximum(ctr_a - 0.5 * size_b, 0.0)        # [y1|x1] at 45:63
    hi = jnp.minimum(ctr_b + 0.5 * size_a, clipmax)    # [y2|x2] at 63:81

    # Lane-mask blends + ONE dense 128-lane store.
    out = jnp.where(lane < 9, sig, head_a)
    out = jnp.where((lane >= 45) & (lane < 63), lo, out)
    out = jnp.where((lane >= 63) & (lane < 81), hi, out)
    out_ref[...] = out


# ---------------------------------------------------------------------------
# Plain-JAX glue (top-k / NMS have no clean fixed-shape Pallas equivalent)
# ---------------------------------------------------------------------------
def _nms_fixed(boxes, scores, iou_threshold, max_out):
    """Greedy NMS, fixed iteration count, per-iteration IoU (O(N*max_out))."""
    y1, x1, y2, x2 = boxes[:, 0], boxes[:, 1], boxes[:, 2], boxes[:, 3]
    areas = (y2 - y1) * (x2 - x1)

    def body(i, state):
        sel_idx, sel_valid, alive = state
        masked = jnp.where(alive, scores, -jnp.inf)
        best = jnp.argmax(masked).astype(jnp.int32)
        valid = jnp.isfinite(masked[best])
        by1, bx1, by2, bx2 = boxes[best, 0], boxes[best, 1], boxes[best, 2], boxes[best, 3]
        yy1 = jnp.maximum(y1, by1)
        xx1 = jnp.maximum(x1, bx1)
        yy2 = jnp.minimum(y2, by2)
        xx2 = jnp.minimum(x2, bx2)
        inter = jnp.maximum(yy2 - yy1, 0.0) * jnp.maximum(xx2 - xx1, 0.0)
        iou = inter / (areas + areas[best] - inter + 1e-8)
        sel_idx = sel_idx.at[i].set(best)
        sel_valid = sel_valid.at[i].set(valid)
        alive = jnp.where(valid, alive & (iou <= iou_threshold), alive)
        alive = alive.at[best].set(False)
        return sel_idx, sel_valid, alive

    state = (jnp.zeros((max_out,), jnp.int32),
             jnp.zeros((max_out,), bool),
             jnp.isfinite(scores))
    sel_idx, sel_valid, _ = lax.fori_loop(0, max_out, body, state)
    return sel_idx, sel_valid


def _pick_row_tile(fh, fw):
    """Rows per grid step: want >=2 grid steps (v7x megacore), tile rows*fw a
    multiple of 8, and <= 512 output rows per tile."""
    best = None
    for tr in range(1, fh + 1):
        if fh % tr:
            continue
        tm = tr * fw
        if tm % 8:
            continue
        if fh // tr >= 2 and tm <= 512:
            if best is None or tr > best:
                best = tr
    if best is not None:
        return best
    for tr in range(1, fh + 1):
        if fh % tr == 0 and (tr * fw) % 8 == 0:
            return tr
    return fh


def _build_conv_input(feature_map):
    """NCHW -> channels-last, zero-pad, column (kx) im2col only: 3x bytes."""
    _, c, fh, fw = feature_map.shape
    x = jnp.transpose(feature_map[0], (1, 2, 0)).astype(jnp.bfloat16)  # (fh, fw, c)
    x_pad = jnp.pad(x, ((1, 1), (1, 1), (0, 0)))                       # (fh+2, fw+2, c)
    x_cols = jnp.concatenate(
        [x_pad[:, kx:kx + fw, :] for kx in range(3)], axis=-1)         # (fh+2, fw, 3c)
    return x_cols.reshape((fh + 2) * fw, 3 * c)


def rpn_forward(prepared_params, feature_map, image_shape, anchor_map,
                anchor_valid_map, anchors_lanes, max_proposals_pre_nms,
                max_proposals_post_nms):
    w1k, b1, whead, bhead = prepared_params
    n, c, fh, fw = feature_map.shape
    assert n == 1
    assert fw % 8 == 0, "feature width must be a multiple of 8 for this kernel"
    hw = fh * fw
    num_anchors = 9

    tr = _pick_row_tile(fh, fw)
    tm = tr * fw
    x2d = _build_conv_input(feature_map)          # ((fh+2)*fw, 3c) bf16
    n_rows_pad = (fh + 2) * fw

    kernel = functools.partial(rpn_fused_kernel, fw=fw, tr=tr, c=c,
                               img_h=float(image_shape[1]),
                               img_w=float(image_shape[2]))

    # VMEM sizing from actual operand bytes (headroom for double buffering).
    resident = (x2d.nbytes + w1k.nbytes + b1.nbytes + whead.nbytes + bhead.nbytes)
    per_step = tm * 256 * 4 + tm * 128 * 4
    vmem_limit = int(min(48 * 2**20,
                         max(16 * 2**20, 2 * resident + 4 * per_step + 8 * 2**20)))

    fused = pl.pallas_call(
        kernel,
        out_shape=jax.ShapeDtypeStruct((hw, 128), jnp.float32),
        grid_spec=pltpu.PrefetchScalarGridSpec(
            num_scalar_prefetch=0,
            grid=(fh // tr,),
            in_specs=[
                pl.BlockSpec((n_rows_pad, 3 * c), lambda i: (0, 0)),  # conv slab (resident)
                pl.BlockSpec((9 * c, c), lambda i: (0, 0)),           # w1 (resident)
                pl.BlockSpec((1, c), lambda i: (0, 0)),               # b1
                pl.BlockSpec((c, 256), lambda i: (0, 0)),             # fused head W
                pl.BlockSpec((1, 256), lambda i: (0, 0)),             # fused head b
                pl.BlockSpec((tm, 256), lambda i: (i, 0)),            # lane-aligned anchors
            ],
            out_specs=pl.BlockSpec((tm, 128), lambda i: (i, 0)),
        ),
        compiler_params=pltpu.CompilerParams(
            dimension_semantics=("parallel",),
            vmem_limit_bytes=vmem_limit,
        ),
    )(x2d, w1k, b1, whead, bhead, anchors_lanes)

    obj_flat = fused[:, 0:9]            # post-sigmoid scores
    box_flat = fused[:, 9:45]           # raw deltas, anchor-major
    props_cm = fused[:, 45:81]          # clipped boxes, coord-major [y1|x1|y2|x2]

    # equivalent of .permute(0, 2, 3, 1)
    objectness_score_map = obj_flat.reshape(1, fh, fw, num_anchors)
    box_deltas_map = box_flat.reshape(1, fh, fw, num_anchors * 4)

    n_total = hw * num_anchors
    proposals_all = props_cm.reshape(hw, 4, num_anchors).transpose(0, 2, 1) \
                            .reshape(n_total, 4)
    scores = obj_flat.reshape(n_total)
    anchors_valid = anchor_valid_map.reshape(n_total) > 0

    # allow_edge_proposals=False: invalid anchors masked with -inf scores.
    masked_scores = jnp.where(anchors_valid, scores, -jnp.inf)
    k = int(min(max_proposals_pre_nms, n_total))
    sc, order = lax.top_k(masked_scores, k)       # descending, replaces argsort
    props = proposals_all[order]

    heights = props[:, 2] - props[:, 0]
    widths = props[:, 3] - props[:, 1]
    keep = (heights >= 16.0) & (widths >= 16.0) & jnp.isfinite(sc)
    sc = jnp.where(keep, sc, -jnp.inf)

    # TODO(synk): torchvision.ops.nms returns a variable-length index set;
    # here we use fixed-iteration greedy NMS and zero-pad to max_proposals_post_nms.
    sel_idx, sel_valid = _nms_fixed(props, sc, 0.7, max_proposals_post_nms)
    proposals = jnp.where(sel_valid[:, None], props[sel_idx], 0.0)

    return objectness_score_map, box_deltas_map, proposals


# ---------------------------------------------------------------------------
# Parameter / anchor construction (done once, kernel-ready layouts)
# ---------------------------------------------------------------------------
def init_params(key, c):
    # matches torch init: weights ~ N(0, 0.01), biases = 0 (OIHW layout)
    k1, k2, k3 = jax.random.split(key, 3)
    w1_oihw = 0.01 * jax.random.normal(k1, (c, c, 3, 3), jnp.float32)
    wc_oihw = 0.01 * jax.random.normal(k2, (9, c, 1, 1), jnp.float32)
    wb_oihw = 0.01 * jax.random.normal(k3, (36, c, 1, 1), jnp.float32)
    b1 = jnp.zeros((c,), jnp.float32)
    bc = jnp.zeros((9,), jnp.float32)
    bb = jnp.zeros((36,), jnp.float32)
    return w1_oihw, b1, wc_oihw, bc, wb_oihw, bb


def prepare_rpn_params(raw_params):
    """One-time conversion of torch-layout weights to kernel-ready layouts."""
    w1_oihw, b1, wc_oihw, bc, wb_oihw, bb = raw_params
    c = w1_oihw.shape[1]
    # 3x3 conv: (Cout, Cin, ky, kx) -> (ky, kx, Cin, Cout) -> (9*Cin, Cout)
    w1k = jnp.transpose(w1_oihw, (2, 3, 1, 0)).reshape(9 * c, c).astype(jnp.bfloat16)
    wc = jnp.transpose(wc_oihw[:, :, 0, 0], (1, 0))   # (C, 9)
    wb = jnp.transpose(wb_oihw[:, :, 0, 0], (1, 0))   # (C, 36) anchor-major

    def cm_w(order):
        return jnp.concatenate([wb[:, k::4] for k in order], axis=1)

    def cm_b(order):
        return jnp.concatenate([bb[k::4] for k in order], axis=0)

    wb_cm = cm_w((0, 1, 2, 3))   # [ty|tx|th|tw]
    wb_sw = cm_w((2, 3, 0, 1))   # [th|tw|ty|tx]  (swapped copy for vreg B)
    bb_cm = cm_b((0, 1, 2, 3))
    bb_sw = cm_b((2, 3, 0, 1))

    zc = lambda nn: jnp.zeros((c, nn), jnp.float32)
    zb = lambda nn: jnp.zeros((nn,), jnp.float32)
    # vreg A (cols 0:128): [cls(9) | box a-major(36) | ty|tx|th|tw(36) | 0(47)]
    # vreg B (cols 128:256): [0(45) | th|tw|ty|tx(36) | 0(47)]
    whead = jnp.concatenate(
        [wc, wb, wb_cm, zc(47), zc(45), wb_sw, zc(47)], axis=1).astype(jnp.bfloat16)
    bhead = jnp.concatenate(
        [bc, bb, bb_cm, zb(47), zb(45), bb_sw, zb(47)], axis=0)[None, :]
    return w1k, b1[None, :], whead, bhead


def build_anchors(fh, fw, img_h, img_w, stride=16.0):
    scales = [32.0, 64.0, 96.0]
    ratios = [0.5, 1.0, 2.0]
    sizes = np.array([(s * np.sqrt(r), s / np.sqrt(r))
                      for s in scales for r in ratios], np.float32)   # (9, 2)
    ys = (np.arange(fh, dtype=np.float32) + 0.5) * stride
    xs = (np.arange(fw, dtype=np.float32) + 0.5) * stride
    cy, cx = np.meshgrid(ys, xs, indexing="ij")
    anchor4 = np.zeros((fh, fw, 9, 4), np.float32)
    anchor4[..., 0] = cy[..., None]
    anchor4[..., 1] = cx[..., None]
    anchor4[..., 2] = sizes[None, None, :, 0]
    anchor4[..., 3] = sizes[None, None, :, 1]
    valid = ((anchor4[..., 0] - 0.5 * anchor4[..., 2] >= 0.0) &
             (anchor4[..., 1] - 0.5 * anchor4[..., 3] >= 0.0) &
             (anchor4[..., 0] + 0.5 * anchor4[..., 2] <= img_h) &
             (anchor4[..., 1] + 0.5 * anchor4[..., 3] <= img_w))
    hw = fh * fw
    a = anchor4.reshape(hw, 9, 4)
    acy, acx, ah, aw = a[:, :, 0], a[:, :, 1], a[:, :, 2], a[:, :, 3]
    # Lane-aligned anchors (match the head layout so the decode is pure VPU):
    size_lane = np.zeros((hw, 128), np.float32)
    size_lane[:, 45:54] = ah
    size_lane[:, 54:63] = aw
    size_lane[:, 63:72] = ah
    size_lane[:, 72:81] = aw
    ctr_lane = np.zeros((hw, 128), np.float32)
    ctr_lane[:, 45:54] = acy
    ctr_lane[:, 54:63] = acx
    ctr_lane[:, 63:72] = acy
    ctr_lane[:, 72:81] = acx
    anchors_lanes = np.concatenate([size_lane, ctr_lane], axis=1)     # (hw, 256)
    return (jnp.asarray(anchor4.reshape(fh, fw, 36)),
            jnp.asarray(valid.astype(np.float32)),
            jnp.asarray(anchors_lanes))


if __name__ == "__main__":
    C, FH, FW = 64, 16, 16               # small feature map, channels
    IMG_SHAPE = (3, 256, 256)            # (channels, height, width)

    key = jax.random.PRNGKey(0)
    kp, kx = jax.random.split(key)
    raw_params = init_params(kp, C)
    prepared = prepare_rpn_params(raw_params)
    feature_map = jax.random.normal(kx, (1, C, FH, FW), jnp.float32)   # NCHW
    anchor_map, anchor_valid_map, anchors_lanes = build_anchors(
        FH, FW, IMG_SHAPE[1], IMG_SHAPE[2])

    obj_map, box_map, proposals = rpn_forward(
        prepared, feature_map, IMG_SHAPE, anchor_map, anchor_valid_map,
        anchors_lanes, max_proposals_pre_nms=64, max_proposals_post_nms=16)

    jax.block_until_ready((obj_map, box_map, proposals))
    assert obj_map.shape == (1, FH, FW, 9)
    assert box_map.shape == (1, FH, FW, 36)
    assert proposals.shape == (16, 4)
    assert bool(jnp.all(jnp.isfinite(obj_map)))
    assert bool(jnp.all(jnp.isfinite(box_map)))
    assert bool(jnp.all(jnp.isfinite(proposals)))
    print("KERNEL_OK")
</pallas_src>

<mosaic_0001>
module attributes {stable_mosaic.version = 11 : i64} {
  func.func @rpn_fused_kernel(%arg0: i32, %arg1: memref<288x192xbf16, #tpu.memory_space<vmem>>, %arg2: memref<576x64xbf16, #tpu.memory_space<vmem>>, %arg3: memref<1x64xf32, #tpu.memory_space<vmem>>, %arg4: memref<64x256xbf16, #tpu.memory_space<vmem>>, %arg5: memref<1x256xf32, #tpu.memory_space<vmem>>, %arg6: memref<128x256xf32, #tpu.memory_space<vmem>>, %arg7: memref<128x128xf32, #tpu.memory_space<vmem>>) attributes {dimension_semantics = [#tpu.dimension_semantics<parallel>], iteration_bounds = array<i64: 2>, scalar_prefetch = 0 : i64, scratch_operands = 0 : i64, tpu.core_type = #tpu.core_type<tc>, window_params = [{pipeline_mode = #tpu.pipeline_mode<synchronous>, transform_indices = @transform_0, window_bounds = array<i64: 288, 192>}, {pipeline_mode = #tpu.pipeline_mode<synchronous>, transform_indices = @transform_1, window_bounds = array<i64: 576, 64>}, {pipeline_mode = #tpu.pipeline_mode<synchronous>, transform_indices = @transform_2, window_bounds = array<i64: 1, 64>}, {pipeline_mode = #tpu.pipeline_mode<synchronous>, transform_indices = @transform_3, window_bounds = array<i64: 64, 256>}, {pipeline_mode = #tpu.pipeline_mode<synchronous>, transform_indices = @transform_4, window_bounds = array<i64: 1, 256>}, {transform_indices = @transform_5, window_bounds = array<i64: 128, 256>}, {transform_indices = @transform_6, window_bounds = array<i64: 128, 128>}]} {
    %cst = arith.constant 0.000000e+00 : f32
    %0 = vector.broadcast %cst : f32 to vector<128x64xf32>
    %c8_i32 = arith.constant 8 : i32
    %1 = arith.muli %arg0, %c8_i32 : i32
    %c0_i32 = arith.constant 0 : i32
    %2 = arith.addi %1, %c0_i32 : i32
    %c16_i32 = arith.constant 16 : i32
    %3 = arith.muli %2, %c16_i32 : i32
    %4 = tpu.assume_multiple %3, 8 : i32
    %5 = arith.index_cast %4 : i32 to index
    %c0 = arith.constant 0 : index
    %6 = vector.load %arg1[%5, %c0] : memref<288x192xbf16, #tpu.memory_space<vmem>>, vector<128x192xbf16>
    %c0_0 = arith.constant 0 : index
    %c0_1 = arith.constant 0 : index
    %7 = vector.load %arg2[%c0_0, %c0_1] : memref<576x64xbf16, #tpu.memory_space<vmem>>, vector<192x64xbf16>
    %cst_2 = arith.constant dense<0.000000e+00> : vector<128x64xf32>
    %8 = tpu.matmul %6, %7, %cst_2 {dimension_numbers = #tpu.dot_dimension_numbers<[1], [0], [0], [1], [0, 0, 1, 1], [], []>} : vector<128x192xbf16>, vector<192x64xbf16>, vector<128x64xf32> -> vector<128x64xf32>
    %9 = arith.addf %0, %8 : vector<128x64xf32>
    %c8_i32_3 = arith.constant 8 : i32
    %10 = arith.muli %arg0, %c8_i32_3 : i32
    %c1_i32 = arith.constant 1 : i32
    %11 = arith.addi %10, %c1_i32 : i32
    %c16_i32_4 = arith.constant 16 : i32
    %12 = arith.muli %11, %c16_i32_4 : i32
    %13 = tpu.assume_multiple %12, 8 : i32
    %14 = arith.index_cast %13 : i32 to index
    %c0_5 = arith.constant 0 : index
    %15 = vector.load %arg1[%14, %c0_5] : memref<288x192xbf16, #tpu.memory_space<vmem>>, vector<128x192xbf16>
    %c192 = arith.constant 192 : index
    %c0_6 = arith.constant 0 : index
    %16 = vector.load %arg2[%c192, %c0_6] : memref<576x64xbf16, #tpu.memory_space<vmem>>, vector<192x64xbf16>
    %cst_7 = arith.constant dense<0.000000e+00> : vector<128x64xf32>
    %17 = tpu.matmul %15, %16, %cst_7 {dimension_numbers = #tpu.dot_dimension_numbers<[1], [0], [0], [1], [0, 0, 1, 1], [], []>} : vector<128x192xbf16>, vector<192x64xbf16>, vector<128x64xf32> -> vector<128x64xf32>
    %18 = arith.addf %9, %17 : vector<128x64xf32>
    %c8_i32_8 = arith.constant 8 : i32
    %19 = arith.muli %arg0, %c8_i32_8 : i32
    %c2_i32 = arith.constant 2 : i32
    %20 = arith.addi %19, %c2_i32 : i32
    %c16_i32_9 = arith.constant 16 : i32
    %21 = arith.muli %20, %c16_i32_9 : i32
    %22 = tpu.assume_multiple %21, 8 : i32
    %23 = arith.index_cast %22 : i32 to index
    %c0_10 = arith.constant 0 : index
    %24 = vector.load %arg1[%23, %c0_10] : memref<288x192xbf16, #tpu.memory_space<vmem>>, vector<128x192xbf16>
    %c384 = arith.constant 384 : index
    %c0_11 = arith.constant 0 : index
    %25 = vector.load %arg2[%c384, %c0_11] : memref<576x64xbf16, #tpu.memory_space<vmem>>, vector<192x64xbf16>
    %cst_12 = arith.constant dense<0.000000e+00> : vector<128x64xf32>
    %26 = tpu.matmul %24, %25, %cst_12 {dimension_numbers = #tpu.dot_dimension_numbers<[1], [0], [0], [1], [0, 0, 1, 1], [], []>} : vector<128x192xbf16>, vector<192x64xbf16>, vector<128x64xf32> -> vector<128x64xf32>
    %27 = arith.addf %18, %26 : vector<128x64xf32>
    %c0_13 = arith.constant 0 : index
    %c0_14 = arith.constant 0 : index
    %28 = vector.load %arg3[%c0_13, %c0_14] : memref<1x64xf32, #tpu.memory_space<vmem>>, vector<1x64xf32>
    %29 = vector.broadcast %28 : vector<1x64xf32> to vector<128x64xf32>
    %30 = arith.addf %27, %29 : vector<128x64xf32>
    %cst_15 = arith.constant 0.000000e+00 : f32
    %31 = vector.broadcast %cst_15 : f32 to vector<128x64xf32>
    %32 = arith.maximumf %30, %31 : vector<128x64xf32>
    %33 = arith.truncf %32 : vector<128x64xf32> to vector<128x64xbf16>
    %c0_16 = arith.constant 0 : index
    %c0_17 = arith.constant 0 : index
    %34 = vector.load %arg4[%c0_16, %c0_17] : memref<64x256xbf16, #tpu.memory_space<vmem>>, vector<64x256xbf16>
    %cst_18 = arith.constant dense<0.000000e+00> : vector<128x256xf32>
    %35 = tpu.matmul %33, %34, %cst_18 {dimension_numbers = #tpu.dot_dimension_numbers<[1], [0], [0], [1], [0, 0, 1, 1], [], []>} : vector<128x64xbf16>, vector<64x256xbf16>, vector<128x256xf32> -> vector<128x256xf32>
    %c0_19 = arith.constant 0 : index
    %c0_20 = arith.constant 0 : index
    %36 = vector.load %arg5[%c0_19, %c0_20] : memref<1x256xf32, #tpu.memory_space<vmem>>, vector<1x256xf32>
    %37 = vector.broadcast %36 : vector<1x256xf32> to vector<128x256xf32>
    %38 = arith.addf %35, %37 : vector<128x256xf32>
    %39 = vector.extract_strided_slice %38 {offsets = [0, 0], sizes = [128, 128], strides = [1, 1]} : vector<128x256xf32> to vector<128x128xf32>
    %40 = vector.extract_strided_slice %38 {offsets = [0, 128], sizes = [128, 128], strides = [1, 1]} : vector<128x256xf32> to vector<128x128xf32>
    %c0_21 = arith.constant 0 : index
    %c0_22 = arith.constant 0 : index
    %41 = vector.load %arg6[%c0_21, %c0_22] : memref<128x256xf32, #tpu.memory_space<vmem>>, vector<128x256xf32>
    %42 = vector.extract_strided_slice %41 {offsets = [0, 0], sizes = [128, 128], strides = [1, 1]} : vector<128x256xf32> to vector<128x128xf32>
    %43 = vector.extract_strided_slice %41 {offsets = [0, 128], sizes = [128, 128], strides = [1, 1]} : vector<128x256xf32> to vector<128x128xf32>
    %44 = tpu.iota {dimensions = array<i32: 1>} : vector<128x128xi32>
    %45 = tpu.iota {dimensions = array<i32: 1>} : vector<128x256xi32>
    %c9_i32 = arith.constant 9 : i32
    %46 = vector.broadcast %c9_i32 : i32 to vector<128x256xi32>
    %47 = arith.cmpi slt, %45, %46 : vector<128x256xi32>
    %c63_i32 = arith.constant 63 : i32
    %48 = vector.broadcast %c63_i32 : i32 to vector<128x256xi32>
    %49 = arith.cmpi sge, %45, %48 : vector<128x256xi32>
    %c81_i32 = arith.constant 81 : i32
    %50 = vector.broadcast %c81_i32 : i32 to vector<128x256xi32>
    %51 = arith.cmpi slt, %45, %50 : vector<128x256xi32>
    %52 = arith.andi %49, %51 : vector<128x256xi1>
    %c173_i32 = arith.constant 173 : i32
    %53 = vector.broadcast %c173_i32 : i32 to vector<128x256xi32>
    %54 = arith.cmpi sge, %45, %53 : vector<128x256xi32>
    %c191_i32 = arith.constant 191 : i32
    %55 = vector.broadcast %c191_i32 : i32 to vector<128x256xi32>
    %56 = arith.cmpi slt, %45, %55 : vector<128x256xi32>
    %57 = arith.andi %54, %56 : vector<128x256xi1>
    %cst_23 = arith.constant 1.000000e+00 : f32
    %cst_24 = arith.constant 0.000000e+00 : f32
    %58 = vector.broadcast %cst_23 : f32 to vector<128x256xf32>
    %59 = vector.broadcast %cst_24 : f32 to vector<128x256xf32>
    %60 = arith.select %57, %58, %59 : vector<128x256xi1>, vector<128x256xf32>
    %cst_25 = arith.constant 1.000000e+00 : f32
    %61 = vector.broadcast %cst_25 : f32 to vector<128x256xf32>
    %62 = arith.select %52, %61, %60 : vector<128x256xi1>, vector<128x256xf32>
    %cst_26 = arith.constant -1.000000e+00 : f32
    %63 = vector.broadcast %cst_26 : f32 to vector<128x256xf32>
    %64 = arith.select %47, %63, %62 : vector<128x256xi1>, vector<128x256xf32>
    %65 = arith.mulf %38, %64 : vector<128x256xf32>
    %66 = math.exp %65 : vector<128x256xf32>
    %67 = vector.extract_strided_slice %66 {offsets = [0, 0], sizes = [128, 128], strides = [1, 1]} : vector<128x256xf32> to vector<128x128xf32>
    %68 = vector.extract_strided_slice %66 {offsets = [0, 128], sizes = [128, 128], strides = [1, 1]} : vector<128x256xf32> to vector<128x128xf32>
    %cst_27 = arith.constant 1.000000e+00 : f32
    %69 = vector.broadcast %cst_27 : f32 to vector<128x128xf32>
    %70 = arith.addf %69, %67 : vector<128x128xf32>
    %cst_28 = arith.constant 1.000000e+00 : f32
    %71 = vector.broadcast %cst_28 : f32 to vector<128x128xf32>
    %72 = arith.divf %71, %70 : vector<128x128xf32>
    %73 = arith.mulf %42, %67 : vector<128x128xf32>
    %74 = arith.mulf %42, %68 : vector<128x128xf32>
    %75 = arith.mulf %42, %39 : vector<128x128xf32>
    %76 = arith.addf %75, %43 : vector<128x128xf32>
    %77 = arith.mulf %42, %40 : vector<128x128xf32>
    %78 = arith.addf %77, %43 : vector<128x128xf32>
    %c72_i32 = arith.constant 72 : i32
    %79 = vector.broadcast %c72_i32 : i32 to vector<128x128xi32>
    %80 = arith.cmpi slt, %44, %79 : vector<128x128xi32>
    %cst_29 = arith.constant 2.560000e+02 : f32
    %cst_30 = arith.constant 2.560000e+02 : f32
    %81 = vector.broadcast %cst_29 : f32 to vector<128x128xf32>
    %82 = vector.broadcast %cst_30 : f32 to vector<128x128xf32>
    %83 = arith.select %80, %81, %82 : vector<128x128xi1>, vector<128x128xf32>
    %cst_31 = arith.constant 5.000000e-01 : f32
    %84 = vector.broadcast %cst_31 : f32 to vector<128x128xf32>
    %85 = arith.mulf %84, %74 : vector<128x128xf32>
    %86 = arith.subf %76, %85 : vector<128x128xf32>
    %cst_32 = arith.constant 0.000000e+00 : f32
    %87 = vector.broadcast %cst_32 : f32 to vector<128x128xf32>
    %88 = arith.maximumf %86, %87 : vector<128x128xf32>
    %cst_33 = arith.constant 5.000000e-01 : f32
    %89 = vector.broadcast %cst_33 : f32 to vector<128x128xf32>
    %90 = arith.mulf %89, %73 : vector<128x128xf32>
    %91 = arith.addf %78, %90 : vector<128x128xf32>
    %92 = arith.minimumf %91, %83 : vector<128x128xf32>
    %c9_i32_34 = arith.constant 9 : i32
    %93 = vector.broadcast %c9_i32_34 : i32 to vector<128x128xi32>
    %94 = arith.cmpi slt, %44, %93 : vector<128x128xi32>
    %95 = arith.select %94, %72, %39 : vector<128x128xi1>, vector<128x128xf32>
    %c45_i32 = arith.constant 45 : i32
    %96 = vector.broadcast %c45_i32 : i32 to vector<128x128xi32>
    %97 = arith.cmpi sge, %44, %96 : vector<128x128xi32>
    %c63_i32_35 = arith.constant 63 : i32
    %98 = vector.broadcast %c63_i32_35 : i32 to vector<128x128xi32>
    %99 = arith.cmpi slt, %44, %98 : vector<128x128xi32>
    %100 = arith.andi %97, %99 : vector<128x128xi1>
    %101 = arith.select %100, %88, %95 : vector<128x128xi1>, vector<128x128xf32>
    %c63_i32_36 = arith.constant 63 : i32
    %102 = vector.broadcast %c63_i32_36 : i32 to vector<128x128xi32>
    %103 = arith.cmpi sge, %44, %102 : vector<128x128xi32>
    %c81_i32_37 = arith.constant 81 : i32
    %104 = vector.broadcast %c81_i32_37 : i32 to vector<128x128xi32>
    %105 = arith.cmpi slt, %44, %104 : vector<128x128xi32>
    %106 = arith.andi %103, %105 : vector<128x128xi1>
    %107 = arith.select %106, %92, %101 : vector<128x128xi1>, vector<128x128xf32>
    %c0_38 = arith.constant 0 : index
    %c0_39 = arith.constant 0 : index
    %108 = vector.load %arg7[%c0_38, %c0_39] : memref<128x128xf32, #tpu.memory_space<vmem>>, vector<128x128xf32>
    tpu.vector_store %arg7[%c0_38, %c0_39], %107 {strides = array<i32>} : memref<128x128xf32, #tpu.memory_space<vmem>>, vector<128x128xf32>,
    return
  }
  func.func @transform_0(%arg0: i32) -> (i32, i32) {
    %c0_i32 = arith.constant 0 : i32
    %c0_i32_0 = arith.constant 0 : i32
    %c0_i32_1 = arith.constant 0 : i32
    return %c0_i32, %c0_i32_0 : i32, i32
  }
  func.func @transform_1(%arg0: i32) -> (i32, i32) {
    %c0_i32 = arith.constant 0 : i32
    %c0_i32_0 = arith.constant 0 : i32
    %c0_i32_1 = arith.constant 0 : i32
    return %c0_i32, %c0_i32_0 : i32, i32
  }
  func.func @transform_2(%arg0: i32) -> (i32, i32) {
    %c0_i32 = arith.constant 0 : i32
    %c0_i32_0 = arith.constant 0 : i32
    %c0_i32_1 = arith.constant 0 : i32
    return %c0_i32, %c0_i32_0 : i32, i32
  }
  func.func @transform_3(%arg0: i32) -> (i32, i32) {
    %c0_i32 = arith.constant 0 : i32
    %c0_i32_0 = arith.constant 0 : i32
    %c0_i32_1 = arith.constant 0 : i32
    return %c0_i32, %c0_i32_0 : i32, i32
  }
  func.func @transform_4(%arg0: i32) -> (i32, i32) {
    %c0_i32 = arith.constant 0 : i32
    %c0_i32_0 = arith.constant 0 : i32
    %c0_i32_1 = arith.constant 0 : i32
    return %c0_i32, %c0_i32_0 : i32, i32
  }
  func.func @transform_5(%arg0: i32) -> (i32, i32) {
    %c0_i32 = arith.constant 0 : i32
    %c0_i32_0 = arith.constant 0 : i32
    return %arg0, %c0_i32 : i32, i32
  }
  func.func @transform_6(%arg0: i32) -> (i32, i32) {
    %c0_i32 = arith.constant 0 : i32
    %c0_i32_0 = arith.constant 0 : i32
    return %arg0, %c0_i32 : i32, i32
  }
}

</mosaic_0001>

<bundles_post_ra>
// kernel: tpu_custom_call.1
= control target key start
LH: loop header
LB: loop body
LE: loop exit
PB: predicated region body
PF: predicated region fallthrough
CT: control target
= control target key end

     0   :  { %11 = vsyncpa [#allocation3], 0  ;;  %s3598_s0 = inlined_call_operand.vmem [shape: bf16[288,192], index: 0, kind: input, shape index: {}]   ;;  %s3599_s1 = inlined_call_operand.vmem [shape: bf16[576,64], index: 1, kind: input, shape index: {}]   ;;  %s3600_s2 = inlined_call_operand.vmem [shape: f32[1,64], index: 2, kind: input, shape index: {}]   ;;  %s3601_s3 = inlined_call_operand.vmem [shape: bf16[64,256], index: 3, kind: input, shape index: {}]   ;;  %s3602_s4 = inlined_call_operand.vmem [shape: f32[1,256], index: 4, kind: input, shape index: {}]   ;;  %s3603_s5 = inlined_call_operand.hbm [shape: f32[256,256], index: 5, kind: input, shape index: {}]   ;;  %s3604_s6 = inlined_call_operand.hbm [shape: f32[256,128], index: 6, kind: output, shape index: {}]  }
   0x1   :  { %13 = vsyncpa [#allocation3 + $0x1], 0 }
   0x2   :  { %14 = vsyncpa [#allocation4], 0 }
   0x3   :  { %16 = vsyncpa [#allocation4 + $0x1], 0  ;;  %s2593_s21 = smov 0   ;;  %s2595_s22 = smov 0  }
   0x4   :  { %s2597_s23 = smov 0   ;;  %s2599_s24 = smov 0  }
   0x5 LB: > { %s2614_s25 = sadd.s32 4294967295, %s2548_s24   ;;  %s2022_s26 = sadd.s32 4294967294, %s2548_s24   ;;  %s2548_s24 = sphi %s2599_s24, %s3621_s24   ;;  %s2544_s23 = sphi %s2597_s23, %s3620_s23   ;;  %s2540_s22 = sphi %s2595_s22, %s3619_s22   ;;  %s2536_s21 = sphi %s2593_s21, %s3618_s21  }
   0x6   : > { %s2618_s27 = sadd.s32 1, %s2548_s24   ;;  %s134_s28 = sadd.s32 1, %s2544_s23 }
   0x7   : > { %s131_s29 = ssub.s32 %s2548_s24, %s2618_s27  ;;  %p141_p0 = scmp.ne.s32.totalorder %s2544_s23, %s2540_s22 }
   0x8   : > { %p132_p1 = scmp.eq.s32.totalorder %s131_s29, 0  ;;  %p142_p2 = scmp.eq.s32.totalorder %s2548_s24, 0 }
   0x9   : > { %p147_p3 = scmp.ne.s32.totalorder %s2540_s22, %s2536_s21  ;;  %p148_p4 = scmp.eq.s32.totalorder %s2614_s25, 0 }
   0xa   : > { %s2630_s30 = scalar_select %p132_p1, %s2544_s23, %s134_s28  }
   0xb   : > { %p2632_p5 = por %p142_p2, %p141_p0  ;;  %p2636_p6 = por %p148_p4, %p147_p3 }
   0xc   : > { %p171_p7 = scmp.eq.s32.totalorder %s2614_s25, 1  ;;  %p177_p8 = scmp.eq.s32.totalorder %s2022_s26, 1 }
   0xd   : > { %p2196_p10 = scmp.lt.s32.totalorder %s2548_s24, 2  ;;  %s212_s11 = sand.u32 1, %s2544_s23  }
   0xe   : > { %p2643_p11 = por %p171_p7, %p141_p0  ;;  %p2647_p12 = por %p177_p8, %p147_p3 }
   0xf   : > { %s2173_s12 = sshll.u32 %s2548_s24, 12  ;;  %s2025_s13 = sshll.u32 %s212_s11, 8 }
  0x10   : > { %s3608_s9 = scalar_select %p2643_p11, 1, 0 }
  0x11   : > { %s3609_s10 = scalar_select %p2647_p12, 1, 0 }
  0x12   : > { %s2656_s16 = scalar_lea.hbm %s3603_s5, %s2173_s12  ;;  %s216_s17 = scalar_lea.vmem [#allocation2], %s2025_s13 }
  0x13   : > { %s224_s18 = sshll.u32 %s216_s17, 4  ;;  %p2660_p13 = pnand %p2196_p10, %p2632_p5  ;;  %s2664_s18 = int_to_ptr.vmem [resolvable:$true] %s224_s18 }
  0x14   : > { %s2666_s20 = scalar_lea.sflag [#allocation3], %s212_s11  ;;  %s2452_s26 = scalar_lea.hbm %s2656_s16, 4096 }
  0x15   : > { %p2453_p0 = scmp.ne.s32.totalorder %s2656_s16, %s2452_s26  ;;  %p2454_p1 = pneg %p2660_p13 }
  0x16   : > { %s2457_s7 = scalar_lea.hbm %s3603_s5, 8192  ;;  %p2458_p4 = scmp.lt.u32.totalorder %s2656_s16, %s3603_s5 }
  0x17   : > { %p2455_p2 = pnand %p2454_p1, %p2453_p0  ;;  %p2459_p5 = scmp.lt.u32.totalorder %s2457_s7, %s2452_s26 }
  0x18   : > { %p2461_p8 = scmp.lt.u32.totalorder %s2452_s26, %s2656_s16 }
  0x19   : > { %p2456_p3 = pneg %p2455_p2  ;;  %p2460_p7 = por %p2459_p5, %p2458_p4 }
  0x1b   : > { %p2462_p10 = por %p2461_p8, %p2460_p7 }
  0x1d   : > { %p2463_p9 = pnand %p2462_p10, %p2456_p3 }
  0x1f   : > { %2466 = shalt.err (!%p2463_p9)
}
  0x20   : > { %s2467_s11 = scalar_lea.vmem %s2664_s18, 4096  ;;  %s2550_s14 = smov [#allocation2]  }
  0x21   : > { %p2468_p0 = scmp.ne.s32.totalorder %s2664_s18, %s2467_s11  ;;  %s2472_s15 = sshll.u32 %s2550_s14, 4  ;;  %s2473_s15 = int_to_ptr.vmem [resolvable:$false] %s2472_s15 }
  0x22   : > { %s2474_s17 = scalar_lea.vmem %s2473_s15, 8192  ;;  %p2475_p11 = scmp.lt.s32.totalorder %s2664_s18, %s2473_s15 }
  0x23   : > { %p2470_p2 = pnand %p2468_p0, %p2454_p1  ;;  %p2476_p4 = scmp.lt.s32.totalorder %s2474_s17, %s2467_s11 }
  0x25   : > { %p2471_p12 = pneg %p2470_p2  ;;  %p2477_p5 = por %p2476_p4, %p2475_p11 }
  0x27   : > { %p2478_p7 = pnand %p2477_p5, %p2471_p12 }
  0x29   : > { %2481 = shalt.err (!%p2478_p7)
}
  0x2a   : > { %s2551_s26 = smov 256   ;;  %s2552_s28 = smov 16  }
  0x2b   : > { %2191 = dma.hbm_to_vmem [thread:$0]  (!%p2660_p13), %s2656_s16, 4096, %s2664_s18, %s2666_s20, %s2551_s26, %s2551_s26, %s2552_s28  }
  0x2c   : > { %p2029_p9 = scmp.ge.s32.totalorder %s2548_s24, 1  ;;  %p232_p1 = scmp.lt.s32.totalorder %s2548_s24, 3 }
  0x2e   : > { %p233_p3 = pnand %p2029_p9, %p232_p1 }
  0x2f   : > { %s2697_s29 = sand.u32 (!%p233_p3), 1, %s2540_s22  }
  0x30   : > { %236 = sbr.rel (%p233_p3) target bundleno = 736 (0x2e0), region = 44  ;;  %s2030_s7 = sshll.u32 (!%p233_p3), %s2697_s29, 8 }
  0x31   : > { %s239_s12 = scalar_lea.sflag (!%p233_p3), [#allocation3], %s2697_s29  ;;  %s2701_s13 = scalar_lea.vmem (!%p233_p3), [#allocation2], %s2030_s7 }
  0x37   : > { %2527 = dma.done.wait (%p2636_p6), %s239_s12, 4096  }
  0x38   : > { %2529 = vsyncadd (%p2636_p6), %s239_s12, 4294963200  ;;  %v2553_v0 = vmov 0   ;;  %v2236_v1 = vld [vmem:[%s3599_s1 + $0x60] sm:$0xff]   ;;  %v2238_v3 = vld [vmem:[%s3599_s1 + $0x68] sm:$0xff]   ;;  %s2735_s18 = sshll.u32 %s2614_s25, 7  ;;  %vm512_vm0 = vcmask 523264  }
  0x39   : > { %537 = vmatprep.subr.bf16.mxu0 %v2553_v0  ;;  %802 = vmatprep.subr.bf16.mxu1 %v2553_v0  ;;  %v2237_v2 = vld [vmem:[%s3599_s1] sm:$0xff]   ;;  %v2239_v4 = vld [vmem:[%s3599_s1 + $0x8] sm:$0xff]   ;;  %v2240_v5 = vld [vmem:[%s3599_s1 + $0x70] sm:$0xff]   ;;  %s2176_s11 = sadd.s32 16, %s2735_s18  ;;  %s2775_s12 = scalar_lea.vmem %s3598_s0, %s2735_s18 }
  0x3a   : > { %538 = vmatpush1.bf16.msra.mxu0 %v2236_v1  ;;  %803 = vmatpush1.bf16.msra.mxu1 %v2237_v2  ;;  %v2241_v6 = vld [vmem:[%s3599_s1 + $0x10] sm:$0xff]   ;;  %v2242_v7 = vld [vmem:[%s3599_s1 + $0x78] sm:$0xff]   ;;  %v2244_v9 = vld [vmem:[%s3599_s1 + $0x80] sm:$0xff]   ;;  %s323_s26 = sshra.s32 %s2176_s11, 3  ;;  %s2179_s20 = sadd.s32 32, %s2735_s18 }
  0x3b   : > { %539 = vmatprep.subr.bf16.mxu0 %v2553_v0  ;;  %804 = vmatprep.subr.bf16.mxu1 %v2553_v0  ;;  %v2243_v8 = vld [vmem:[%s3599_s1 + $0x18] sm:$0xff]   ;;  %v2245_v10 = vld [vmem:[%s3599_s1 + $0x20] sm:$0xff]   ;;  %v2246_v11 = vld [vmem:[%s3599_s1 + $0x88] sm:$0xff]   ;;  %s2177_s19 = sshll.u32 %s323_s26, 3  ;;  %s901_s14 = sshra.s32 %s2179_s20, 3 }
  0x3c   : > { %v2247_v12 = vld [vmem:[%s3599_s1 + $0x28] sm:$0xff]   ;;  %v2248_v13 = vld [vmem:[%s3599_s1 + $0x90] sm:$0xff]   ;;  %s2765_s15 = scalar_lea.vmem %s3598_s0, %s2177_s19  ;;  %v2250_v16 = vld [vmem:[%s3599_s1 + $0x98] sm:$0xff]   ;;  %s2180_s18 = sshll.u32 %s901_s14, 3 }
  0x3d   : > { %v2249_v14 = vld [vmem:[%s3599_s1 + $0x30] sm:$0xff]   ;;  %v2262_v15 = vld [vmem:[%s2765_s15 + $0x4] ss:$8 sps:$4 sm:$0xff]   ;;  %v2251_v18 = vld [vmem:[%s3599_s1 + $0x38] sm:$0xff]   ;;  %s2848_s16 = scalar_lea.vmem %s3598_s0, %s2180_s18  ;;  %s2031_s11 = sshll.u32 %s2697_s29, 7 }
  0x3e   : > { %540 = vmatpush1.bf16.msra.mxu0 %v2238_v3  ;;  %805 = vmatpush1.bf16.msra.mxu1 %v2239_v4  ;;  %v2265_v17 = vld [vmem:[%s2775_s12 + $0x4] ss:$8 sps:$4 sm:$0xff]   ;;  %v2256_v23 = vld [vmem:[%s3599_s1 + $0xb0] sm:$0xff]   ;;  %v2258_v25 = vld [vmem:[%s3599_s1 + $0xb8] sm:$0xff]   ;;  %s3212_s8 = scalar_lea.vmem [#allocation5], %s2031_s11  ;;  %p3615_p11 = scmp.ne.s32.totalorder %s3608_s9, 0 }
  0x3f   : > { %541 = vmatprep.subr.bf16.mxu0 %v2553_v0  ;;  %806 = vmatprep.subr.bf16.mxu1 %v2553_v0  ;;  %v2252_v19 = vld [vmem:[%s3599_s1 + $0xa0] sm:$0xff]   ;;  %v2254_v21 = vld [vmem:[%s3599_s1 + $0xa8] sm:$0xff]   ;;  %v2257_v24 = vld [vmem:[%s3599_s1 + $0x50] sm:$0xff]   ;;  %s1943_s18 = sshll.u32 %s3212_s8, 4  ;;  %s2555_s26 = smov [#allocation5]   ;;  %s3549_s18 = int_to_ptr.vmem [resolvable:$true] %s1943_s18 }
  0x40   : > { %2067 = vmatprep.mubr.msk.bf16.mxu0 %vm512_vm0, %v2262_v15  ;;  %2103 = vmatprep.mubr.msk.bf16.mxu1 %vm512_vm0, %v2265_v17  ;;  %v2253_v20 = vld [vmem:[%s3599_s1 + $0x40] sm:$0xff]   ;;  %v2255_v22 = vld [vmem:[%s3599_s1 + $0x48] sm:$0xff]   ;;  %v2259_v26 = vld [vmem:[%s3599_s1 + $0x58] sm:$0xff]   ;;  %s2486_s7 = sshll.u32 %s2555_s26, 4  ;;  %s2487_s7 = int_to_ptr.vmem [resolvable:$false] %s2486_s7 }
  0x41   : > { %v2260_v27 = vld [vmem:[%s2765_s15] ss:$8 sps:$4 sm:$0xff]   ;;  %v2267_v30 = vld [vmem:[%s2765_s15 + $0x14] ss:$8 sps:$4 sm:$0xff]   ;;  %v2272_v33 = vld [vmem:[%s2765_s15 + $0x10] ss:$8 sps:$4 sm:$0xff]   ;;  %p2489_p8 = scmp.lt.s32.totalorder %s3549_s18, %s2487_s7 }
  0x42   : > { %542 = vmatpush1.bf16.msra.mxu0 %v2240_v5  ;;  %807 = vmatpush1.bf16.msra.mxu1 %v2241_v6  ;;  %v2263_v28 = vld [vmem:[%s2775_s12] ss:$8 sps:$4 sm:$0xff]   ;;  %v2269_v31 = vld [vmem:[%s2775_s12 + $0x14] ss:$8 sps:$4 sm:$0xff]   ;;  %v2273_v34 = vld [vmem:[%s2775_s12 + $0x10] ss:$8 sps:$4 sm:$0xff]  }
  0x43   : > { %543 = vmatprep.subr.bf16.mxu0 %v2553_v0  ;;  %808 = vmatprep.subr.bf16.mxu1 %v2553_v0  ;;  %v2266_v29 = vld [vmem:[%s3599_s1 + $0xc0] sm:$0xff]   ;;  %v2271_v32 = vld [vmem:[%s3599_s1 + $0xc8] sm:$0xff]   ;;  %v2274_v35 = vld [vmem:[%s3599_s1 + $0xd0] sm:$0xff]  }
  0x44   : > { %v2275_v36 = vld [vmem:[%s2765_s15 + $0x24] ss:$8 sps:$4 sm:$0xff]   ;;  %v2281_v38 = vld [vmem:[%s3599_s1 + $0xd8] sm:$0xff]   ;;  %v2279_v39 = vld [vmem:[%s2765_s15 + $0x20] ss:$8 sps:$4 sm:$0xff]  }
  0x45   : > { %v2277_v37 = vld [vmem:[%s2775_s12 + $0x24] ss:$8 sps:$4 sm:$0xff]   ;;  %v2280_v40 = vld [vmem:[%s2775_s12 + $0x20] ss:$8 sps:$4 sm:$0xff]   ;;  %v2282_v41 = vld [vmem:[%s2765_s15 + $0x34] ss:$8 sps:$4 sm:$0xff]  }
  0x46   : > { %544 = vmatpush1.bf16.msra.mxu0 %v2242_v7  ;;  %809 = vmatpush1.bf16.msra.mxu1 %v2243_v8  ;;  %v2284_v42 = vld [vmem:[%s2775_s12 + $0x34] ss:$8 sps:$4 sm:$0xff]   ;;  %v2286_v43 = vld [vmem:[%s3599_s1 + $0xe0] sm:$0xff]   ;;  %v2287_v44 = vld [vmem:[%s2765_s15 + $0x30] ss:$8 sps:$4 sm:$0xff]  }
  0x47   : > { %545 = vmatprep.subr.bf16.mxu0 %v2553_v0  ;;  %810 = vmatprep.subr.bf16.mxu1 %v2553_v0  ;;  %v2289_v45 = vld [vmem:[%s3599_s1 + $0xe8] sm:$0xff]   ;;  %v2288_v46 = vld [vmem:[%s2775_s12 + $0x30] ss:$8 sps:$4 sm:$0xff]   ;;  %v2297_v53 = vld [vmem:[%s2765_s15 + $0x54] ss:$8 sps:$4 sm:$0xff]  }
  0x48   : > { %v2290_v47 = vld [vmem:[%s2765_s15 + $0x44] ss:$8 sps:$4 sm:$0xff]   ;;  %v2296_v49 = vld [vmem:[%s3599_s1 + $0xf0] sm:$0xff]   ;;  %v2301_v50 = vld [vmem:[%s3599_s1 + $0xf8] sm:$0xff]  }
  0x49   : > { %v2292_v48 = vld [vmem:[%s2775_s12 + $0x44] ss:$8 sps:$4 sm:$0xff]   ;;  %v2294_v51 = vld [vmem:[%s2765_s15 + $0x40] ss:$8 sps:$4 sm:$0xff]   ;;  %v2299_v54 = vld [vmem:[%s2775_s12 + $0x54] ss:$8 sps:$4 sm:$0xff]  }
  0x4a   : > { %546 = vmatpush1.bf16.msra.mxu0 %v2244_v9  ;;  %811 = vmatpush1.bf16.msra.mxu1 %v2245_v10  ;;  %v2295_v52 = vld [vmem:[%s2775_s12 + $0x40] ss:$8 sps:$4 sm:$0xff]   ;;  %v2302_v57 = vld [vmem:[%s2765_s15 + $0x50] ss:$8 sps:$4 sm:$0xff]   ;;  %v2305_v59 = vld [vmem:[%s2765_s15 + $0x64] ss:$8 sps:$4 sm:$0xff]  }
  0x4b   : > { %547 = vmatprep.subr.bf16.mxu0 %v2553_v0  ;;  %812 = vmatprep.subr.bf16.mxu1 %v2553_v0  ;;  %v2304_v55 = vld [vmem:[%s3599_s1 + $0x100] sm:$0xff]   ;;  %v2311_v56 = vld [vmem:[%s3599_s1 + $0x108] sm:$0xff]   ;;  %v2303_v58 = vld [vmem:[%s2775_s12 + $0x50] ss:$8 sps:$4 sm:$0xff]  }
  0x4c   : > { %v2307_v60 = vld [vmem:[%s2775_s12 + $0x64] ss:$8 sps:$4 sm:$0xff]   ;;  %v2316_v61 = vld [vmem:[%s3599_s1 + $0x110] sm:$0xff]   ;;  %v2319_v62 = vld [vmem:[%s3599_s1 + $0x118] sm:$0xff]  }
  0x4d   : > { %v2309_v63 = vld [vmem:[%s2765_s15 + $0x60] ss:$8 sps:$4 sm:$0xff]   ;;  %v2312_v2 = vld [vmem:[%s2765_s15 + $0x74] ss:$8 sps:$4 sm:$0xff]   ;;  %v2317_v4 = vld [vmem:[%s2765_s15 + $0x70] ss:$8 sps:$4 sm:$0xff]  }
  0x4e   : > { %548 = vmatpush1.bf16.msra.mxu0 %v2246_v11  ;;  %813 = vmatpush1.bf16.msra.mxu1 %v2247_v12  ;;  %v2310_v1 = vld [vmem:[%s2775_s12 + $0x60] ss:$8 sps:$4 sm:$0xff]   ;;  %v2314_v3 = vld [vmem:[%s2775_s12 + $0x74] ss:$8 sps:$4 sm:$0xff]   ;;  %v2318_v5 = vld [vmem:[%s2775_s12 + $0x70] ss:$8 sps:$4 sm:$0xff]  }
  0x4f   : > { %549 = vmatprep.subr.bf16.mxu0 %v2553_v0  ;;  %814 = vmatprep.subr.bf16.mxu1 %v2553_v0  ;;  %v2322_v6 = vld [vmem:[%s2848_s16 + $0x4] ss:$8 sps:$4 sm:$0xff]   ;;  %v2320_v7 = vld [vmem:[%s2848_s16] ss:$8 sps:$4 sm:$0xff]   ;;  %v2323_v8 = vld [vmem:[%s2848_s16 + $0x14] ss:$8 sps:$4 sm:$0xff]  }
  0x50   : > { %v2325_v9 = vld [vmem:[%s2848_s16 + $0x10] ss:$8 sps:$4 sm:$0xff]   ;;  %v2326_v10 = vld [vmem:[%s2848_s16 + $0x24] ss:$8 sps:$4 sm:$0xff]   ;;  %v2328_v11 = vld [vmem:[%s2848_s16 + $0x20] ss:$8 sps:$4 sm:$0xff]  }
  0x51   : > { %v2329_v12 = vld [vmem:[%s2848_s16 + $0x34] ss:$8 sps:$4 sm:$0xff]   ;;  %v2334_v15 = vld [vmem:[%s2848_s16 + $0x40] ss:$8 sps:$4 sm:$0xff]   ;;  %s2482_s12 = scalar_lea.vmem %s3549_s18, 2048 }
  0x52   : > { %550 = vmatpush1.bf16.msra.mxu0 %v2248_v13  ;;  %815 = vmatpush1.bf16.msra.mxu1 %v2249_v14  ;;  %v2331_v13 = vld [vmem:[%s2848_s16 + $0x30] ss:$8 sps:$4 sm:$0xff]   ;;  %v2332_v14 = vld [vmem:[%s2848_s16 + $0x44] ss:$8 sps:$4 sm:$0xff]   ;;  %v2344_v17 = vld [vmem:[%s3601_s3] ss:$8 sps:$4 sm:$0xff]   ;;  %p2483_p6 = scmp.ne.s32.totalorder %s3549_s18, %s2482_s12 }
  0x53   : > { %551 = vmatprep.subr.bf16.mxu0 %v2553_v0  ;;  %816 = vmatprep.subr.bf16.mxu1 %v2553_v0 }
  0x54   : > { %p2484_p12 = pnand %p2483_p6, %p3615_p11 }
  0x56   : > { %552 = vmatpush1.bf16.msra.mxu0 %v2250_v16  ;;  %817 = vmatpush1.bf16.msra.mxu1 %v2251_v18  ;;  %v2335_v16 = vld [vmem:[%s2848_s16 + $0x54] ss:$8 sps:$4 sm:$0xff]   ;;  %v2346_v18 = vld [vmem:[%s3601_s3 + $0x4] ss:$8 sps:$4 sm:$0xff]   ;;  %p2485_p13 = pneg %p2484_p12 }
  0x57   : > { %553 = vmatprep.subr.bf16.mxu0 %v2553_v0  ;;  %818 = vmatprep.subr.bf16.mxu1 %v2553_v0 }
  0x5a   : > { %554 = vmatpush1.bf16.msra.mxu0 %v2252_v19  ;;  %819 = vmatpush1.bf16.msra.mxu1 %v2253_v20  ;;  %v2337_v19 = vld [vmem:[%s2848_s16 + $0x50] ss:$8 sps:$4 sm:$0xff]   ;;  %v2338_v20 = vld [vmem:[%s2848_s16 + $0x64] ss:$8 sps:$4 sm:$0xff]  }
  0x5b   : > { %555 = vmatprep.subr.bf16.mxu0 %v2553_v0  ;;  %820 = vmatprep.subr.bf16.mxu1 %v2553_v0 }
  0x5e   : > { %556 = vmatpush1.bf16.msra.mxu0 %v2254_v21  ;;  %821 = vmatpush1.bf16.msra.mxu1 %v2255_v22  ;;  %v2340_v21 = vld [vmem:[%s2848_s16 + $0x60] ss:$8 sps:$4 sm:$0xff]   ;;  %v2341_v22 = vld [vmem:[%s2848_s16 + $0x74] ss:$8 sps:$4 sm:$0xff]  }
  0x5f   : > { %557 = vmatprep.subr.bf16.mxu0 %v2553_v0  ;;  %822 = vmatprep.subr.bf16.mxu1 %v2553_v0 }
  0x62   : > { %558 = vmatpush1.bf16.msra.mxu0 %v2256_v23  ;;  %823 = vmatpush1.bf16.msra.mxu1 %v2257_v24  ;;  %v2347_v23 = vld [vmem:[%s3601_s3 + $0x10] ss:$8 sps:$4 sm:$0xff]   ;;  %v2349_v24 = vld [vmem:[%s3601_s3 + $0x14] ss:$8 sps:$4 sm:$0xff]  }
  0x63   : > { %559 = vmatprep.subr.bf16.mxu0 %v2553_v0  ;;  %824 = vmatprep.subr.bf16.mxu1 %v2553_v0 }
  0x66   : > { %560 = vmatpush1.bf16.msra.mxu0 %v2258_v25  ;;  %825 = vmatpush1.bf16.msra.mxu1 %v2259_v26  ;;  %v2343_v25 = vld [vmem:[%s2848_s16 + $0x70] ss:$8 sps:$4 sm:$0xff]   ;;  %v2350_v26 = vld [vmem:[%s3601_s3 + $0x20] ss:$8 sps:$4 sm:$0xff]   ;;  %s2488_s16 = scalar_lea.vmem %s2487_s7, 4096 }
  0x67   : > { %1114 = vmatprep.subr.bf16.mxu0 %v2553_v0  ;;  %1358 = vmatprep.subr.bf16.mxu1 %v2346_v18  ;;  %p2490_p10 = scmp.lt.s32.totalorder %s2488_s16, %s2482_s12 }
  0x69   : > { %570 = vmatmul.mubr.bf16.vlgmr.msra.gmra.mrb[0].mxu0 %v2260_v27  ;;  %835 = vmatmul.mubr.bf16.vlgmr.msra.gmra.mrb[0].mxu1 %v2263_v28  ;;  %v2352_v27 = vld [vmem:[%s3601_s3 + $0x24] ss:$8 sps:$4 sm:$0xff]   ;;  %v2353_v28 = vld [vmem:[%s3601_s3 + $0x30] ss:$8 sps:$4 sm:$0xff]   ;;  %p2491_p0 = por %p2490_p10, %p2489_p8 }
  0x6a   : > { %1115 = vmatpush1.bf16.msra.mxu0 %v2266_v29  ;;  %2068 = vmatprep.mubr.msk.bf16.mxu0 %vm512_vm0, %v2267_v30  ;;  %v2355_v29 = vld [vmem:[%s3601_s3 + $0x34] ss:$8 sps:$4 sm:$0xff]  }
  0x6b   : > { %1116 = vmatprep.subr.bf16.mxu0 %v2553_v0  ;;  %2104 = vmatprep.mubr.msk.bf16.mxu1 %vm512_vm0, %v2269_v31  ;;  %p2492_p2 = pnand %p2491_p0, %p2485_p13 }
  0x6c   : > { %1359 = vmatpush1.bf16.msra.mxu1 %v2344_v17 }
  0x6d   : > { %1360 = vmatprep.subr.bf16.mxu1 %v2349_v24 }
  0x6e   : > { %1117 = vmatpush1.bf16.msra.mxu0 %v2271_v32 }
  0x6f   : > { %1118 = vmatprep.subr.bf16.mxu0 %v2553_v0 }
  0x70   : > { %1361 = vmatpush1.bf16.msra.mxu1 %v2347_v23 }
  0x71   : > { %578 = vmatmul.mubr.bf16.gmra.mrb[4].mxu0 %v2272_v33  ;;  %843 = vmatmul.mubr.bf16.gmra.mrb[4].mxu1 %v2273_v34 }
  0x72   : > { %1119 = vmatpush1.bf16.msra.mxu0 %v2274_v35  ;;  %2069 = vmatprep.mubr.msk.bf16.mxu0 %vm512_vm0, %v2275_v36 }
  0x73   : > { %2105 = vmatprep.mubr.msk.bf16.mxu1 %vm512_vm0, %v2277_v37  ;;  %1120 = vmatprep.subr.bf16.mxu0 %v2553_v0 }
  0x74   : > { %1362 = vmatprep.subr.bf16.mxu1 %v2352_v27 }
  0x75   : > { %1363 = vmatpush1.bf16.msra.mxu1 %v2350_v26 }
  0x76   : > { %1121 = vmatpush1.bf16.msra.mxu0 %v2281_v38  ;;  %1364 = vmatprep.subr.bf16.mxu1 %v2355_v29 }
  0x77   : > { %1122 = vmatprep.subr.bf16.mxu0 %v2553_v0 }
  0x79   : > { %586 = vmatmul.mubr.bf16.gmra.mrb[8].mxu0 %v2279_v39  ;;  %851 = vmatmul.mubr.bf16.gmra.mrb[8].mxu1 %v2280_v40 }
  0x7a   : > { %2070 = vmatprep.mubr.msk.bf16.mxu0 %vm512_vm0, %v2282_v41  ;;  %2106 = vmatprep.mubr.msk.bf16.mxu1 %vm512_vm0, %v2284_v42 }
  0x7b   : > { %1123 = vmatpush1.bf16.msra.mxu0 %v2286_v43  ;;  %1365 = vmatpush1.bf16.msra.mxu1 %v2353_v28 }
  0x7c   : > { %1124 = vmatprep.subr.bf16.mxu0 %v2553_v0 }
  0x7f   : > { %1125 = vmatpush1.bf16.msra.mxu0 %v2289_v45 }
  0x80   : > { %1126 = vmatprep.subr.bf16.mxu0 %v2553_v0 }
  0x81   : > { %594 = vmatmul.mubr.bf16.gmra.mrb[12].mxu0 %v2287_v44  ;;  %859 = vmatmul.mubr.bf16.gmra.mrb[12].mxu1 %v2288_v46 }
  0x82   : > { %2071 = vmatprep.mubr.msk.bf16.mxu0 %vm512_vm0, %v2290_v47  ;;  %2107 = vmatprep.mubr.msk.bf16.mxu1 %vm512_vm0, %v2292_v48 }
  0x83   : > { %1127 = vmatpush1.bf16.msra.mxu0 %v2296_v49 }
  0x84   : > { %1128 = vmatprep.subr.bf16.mxu0 %v2553_v0 }
  0x87   : > { %1129 = vmatpush1.bf16.msra.mxu0 %v2301_v50 }
  0x88   : > { %1130 = vmatprep.subr.bf16.mxu0 %v2553_v0 }
  0x89   : > { %602 = vmatmul.mubr.bf16.gmra.mrb[16].mxu0 %v2294_v51  ;;  %867 = vmatmul.mubr.bf16.gmra.mrb[16].mxu1 %v2295_v52 }
  0x8a   : > { %2072 = vmatprep.mubr.msk.bf16.mxu0 %vm512_vm0, %v2297_v53  ;;  %2108 = vmatprep.mubr.msk.bf16.mxu1 %vm512_vm0, %v2299_v54 }
  0x8b   : > { %1131 = vmatpush1.bf16.msra.mxu0 %v2304_v55 }
  0x8c   : > { %1132 = vmatprep.subr.bf16.mxu0 %v2553_v0 }
  0x8f   : > { %1133 = vmatpush1.bf16.msra.mxu0 %v2311_v56 }
  0x90   : > { %1134 = vmatprep.subr.bf16.mxu0 %v2553_v0 }
  0x91   : > { %610 = vmatmul.mubr.bf16.gmra.mrb[20].mxu0 %v2302_v57  ;;  %875 = vmatmul.mubr.bf16.gmra.mrb[20].mxu1 %v2303_v58 }
  0x92   : > { %2073 = vmatprep.mubr.msk.bf16.mxu0 %vm512_vm0, %v2305_v59  ;;  %2109 = vmatprep.mubr.msk.bf16.mxu1 %vm512_vm0, %v2307_v60 }
  0x93   : > { %1135 = vmatpush1.bf16.msra.mxu0 %v2316_v61 }
  0x94   : > { %1136 = vmatprep.subr.bf16.mxu0 %v2553_v0 }
  0x97   : > { %1137 = vmatpush1.bf16.msra.mxu0 %v2319_v62 }
  0x99   : > { %618 = vmatmul.mubr.bf16.gmra.mrb[24].mxu0 %v2309_v63  ;;  %883 = vmatmul.mubr.bf16.gmra.mrb[24].mxu1 %v2310_v1 }
  0x9a   : > { %2074 = vmatprep.mubr.msk.bf16.mxu0 %vm512_vm0, %v2312_v2  ;;  %2110 = vmatprep.mubr.msk.bf16.mxu1 %vm512_vm0, %v2314_v3 }
  0xa1   : > { %626 = vmatmul.mubr.bf16.gmra.mrb[28].mxu0 %v2317_v4  ;;  %891 = vmatmul.mubr.bf16.gmra.mrb[28].mxu1 %v2318_v5 }
  0xa2   : > { %2142 = vmatprep.mubr.msk.bf16.mxu0 %vm512_vm0, %v2322_v6  ;;  %1390 = vmatprep.mubr.bf16.mxu1 %v2553_v0 }
  0xa9   : > { %1147 = vmatmul.mubr.bf16.vlgmr.msra.gmra.mrb[32].mxu0 %v2320_v7 }
  0xaa   : > { %2143 = vmatprep.mubr.msk.bf16.mxu0 %vm512_vm0, %v2323_v8 }
  0xb1   : > { %1155 = vmatmul.mubr.bf16.gmra.mrb[36].mxu0 %v2325_v9 }
  0xb2   : > { %2144 = vmatprep.mubr.msk.bf16.mxu0 %vm512_vm0, %v2326_v10 }
  0xb9   : > { %1163 = vmatmul.mubr.bf16.gmra.mrb[40].mxu0 %v2328_v11 }
  0xba   : > { %2145 = vmatprep.mubr.msk.bf16.mxu0 %vm512_vm0, %v2329_v12 }
  0xc1   : > { %1171 = vmatmul.mubr.bf16.gmra.mrb[44].mxu0 %v2331_v13 }
  0xc2   : > { %2146 = vmatprep.mubr.msk.bf16.mxu0 %vm512_vm0, %v2332_v14 }
  0xc9   : > { %1179 = vmatmul.mubr.bf16.gmra.mrb[48].mxu0 %v2334_v15 }
  0xca   : > { %2147 = vmatprep.mubr.msk.bf16.mxu0 %vm512_vm0, %v2335_v16 }
  0xd1   : > { %1187 = vmatmul.mubr.bf16.gmra.mrb[52].mxu0 %v2337_v19 }
  0xd2   : > { %2148 = vmatprep.mubr.msk.bf16.mxu0 %vm512_vm0, %v2338_v20 }
  0xd9   : > { %1195 = vmatmul.mubr.bf16.gmra.mrb[56].mxu0 %v2340_v21 }
  0xda   : > { %2149 = vmatprep.mubr.msk.bf16.mxu0 %vm512_vm0, %v2341_v22 }
  0xe1   : > { %1203 = vmatmul.mubr.bf16.gmra.mrb[60].mxu0 %v2343_v25 }
 0x13c   : > { %v571_v30 = vpop.f32.mrb[0].mxu0  ;;  %v836_v31 = vpop.f32.mrb[0].mxu1 }
 0x13d   : > { %v573_v32 = vpop.f32.mrb[1].mxu0  ;;  %v2969_v33 = vadd.f32 %v836_v31, %v571_v30  ;;  %v838_v34 = vpop.f32.mrb[1].mxu1 }
 0x13e   : > { %v574_v35 = vpop.f32.mrb[2].mxu0  ;;  %v839_v36 = vpop.f32.mrb[2].mxu1 }
 0x13f   : > { %v576_v37 = vpop.f32.mrb[3].mxu0  ;;  %v2971_v38 = vadd.f32 %v839_v36, %v574_v35  ;;  %v841_v39 = vpop.f32.mrb[3].mxu1 }
 0x144   : > { %v579_v40 = vpop.f32.mrb[4].mxu0  ;;  %v844_v41 = vpop.f32.mrb[4].mxu1 }
 0x145   : > { %v581_v42 = vpop.f32.mrb[5].mxu0  ;;  %v2973_v43 = vadd.f32 %v844_v41, %v579_v40  ;;  %v846_v44 = vpop.f32.mrb[5].mxu1 }
 0x146   : > { %v582_v45 = vpop.f32.mrb[6].mxu0  ;;  %v847_v46 = vpop.f32.mrb[6].mxu1 }
 0x147   : > { %v584_v47 = vpop.f32.mrb[7].mxu0  ;;  %v2975_v48 = vadd.f32 %v847_v46, %v582_v45  ;;  %v849_v49 = vpop.f32.mrb[7].mxu1 }
 0x14c   : > { %v587_v50 = vpop.f32.mrb[8].mxu0  ;;  %v852_v51 = vpop.f32.mrb[8].mxu1 }
 0x14d   : > { %v589_v52 = vpop.f32.mrb[9].mxu0  ;;  %v2977_v53 = vadd.f32 %v852_v51, %v587_v50  ;;  %v854_v54 = vpop.f32.mrb[9].mxu1 }
 0x14e   : > { %v590_v55 = vpop.f32.mrb[10].mxu0  ;;  %v855_v56 = vpop.f32.mrb[10].mxu1  ;;  %v3004_v52 = vld [vmem:[%s3600_s2] ss:$0 sm:$0xff] }
 0x14f   : > { %v592_v57 = vpop.f32.mrb[11].mxu0  ;;  %v2979_v58 = vadd.f32 %v855_v56, %v590_v55  ;;  %v857_v59 = vpop.f32.mrb[11].mxu1 }
 0x154   : > { %v595_v60 = vpop.f32.mrb[12].mxu0  ;;  %v860_v61 = vpop.f32.mrb[12].mxu1 }
 0x155   : > { %v597_v62 = vpop.f32.mrb[13].mxu0  ;;  %v2981_v63 = vadd.f32 %v860_v61, %v595_v60  ;;  %v862_v1 = vpop.f32.mrb[13].mxu1 }
 0x156   : > { %v598_v2 = vpop.f32.mrb[14].mxu0  ;;  %v863_v3 = vpop.f32.mrb[14].mxu1 }
 0x157   : > { %v600_v4 = vpop.f32.mrb[15].mxu0  ;;  %v2983_v5 = vadd.f32 %v863_v3, %v598_v2  ;;  %v865_v6 = vpop.f32.mrb[15].mxu1 }
 0x15c   : > { %v603_v7 = vpop.f32.mrb[16].mxu0  ;;  %v868_v8 = vpop.f32.mrb[16].mxu1 }
 0x15d   : > { %v605_v9 = vpop.f32.mrb[17].mxu0  ;;  %v2985_v10 = vadd.f32 %v868_v8, %v603_v7  ;;  %v870_v11 = vpop.f32.mrb[17].mxu1 }
 0x15e   : > { %v606_v12 = vpop.f32.mrb[18].mxu0  ;;  %v871_v13 = vpop.f32.mrb[18].mxu1 }
 0x15f   : > { %v608_v14 = vpop.f32.mrb[19].mxu0  ;;  %v2987_v15 = vadd.f32 %v871_v13, %v606_v12  ;;  %v873_v16 = vpop.f32.mrb[19].mxu1 }
 0x164   : > { %v611_v17 = vpop.f32.mrb[20].mxu0  ;;  %v876_v18 = vpop.f32.mrb[20].mxu1 }
 0x165   : > { %v613_v19 = vpop.f32.mrb[21].mxu0  ;;  %v2989_v20 = vadd.f32 %v876_v18, %v611_v17  ;;  %v878_v21 = vpop.f32.mrb[21].mxu1 }
 0x166   : > { %v614_v22 = vpop.f32.mrb[22].mxu0  ;;  %v879_v23 = vpop.f32.mrb[22].mxu1 }
 0x167   : > { %v616_v24 = vpop.f32.mrb[23].mxu0  ;;  %v2991_v25 = vadd.f32 %v879_v23, %v614_v22  ;;  %v881_v26 = vpop.f32.mrb[23].mxu1 }
 0x16c   : > { %v619_v27 = vpop.f32.mrb[24].mxu0  ;;  %v884_v28 = vpop.f32.mrb[24].mxu1 }
 0x16d   : > { %v621_v29 = vpop.f32.mrb[25].mxu0  ;;  %v2993_v30 = vadd.f32 %v884_v28, %v619_v27  ;;  %v886_v31 = vpop.f32.mrb[25].mxu1 }
 0x16e   : > { %v622_v32 = vpop.f32.mrb[26].mxu0  ;;  %v887_v34 = vpop.f32.mrb[26].mxu1 }
 0x16f   : > { %v624_v35 = vpop.f32.mrb[27].mxu0  ;;  %v2995_v36 = vadd.f32 %v887_v34, %v622_v32  ;;  %v889_v37 = vpop.f32.mrb[27].mxu1 }
 0x174   : > { %v627_v39 = vpop.f32.mrb[28].mxu0  ;;  %v892_v40 = vpop.f32.mrb[28].mxu1 }
 0x175   : > { %v629_v41 = vpop.f32.mrb[29].mxu0  ;;  %v2997_v42 = vadd.f32 %v892_v40, %v627_v39  ;;  %v894_v44 = vpop.f32.mrb[29].mxu1 }
 0x176   : > { %v630_v45 = vpop.f32.mrb[30].mxu0  ;;  %v895_v46 = vpop.f32.mrb[30].mxu1 }
 0x177   : > { %v632_v47 = vpop.f32.mrb[31].mxu0  ;;  %v2999_v49 = vadd.f32 %v895_v46, %v630_v45  ;;  %v897_v50 = vpop.f32.mrb[31].mxu1 }
 0x17c   : > { %v1148_v51 = vpop.f32.mrb[32].mxu0 }
 0x17d   : > { %v1211_v54 = vadd.f32 %v1148_v51, %v2969_v33  ;;  %v1150_v55 = vpop.f32.mrb[33].mxu0 }
 0x17e   : > { %v1151_v56 = vpop.f32.mrb[34].mxu0 }
 0x17f   : > { %v1234_v57 = vadd.f32 %v3004_v52, %v1211_v54  ;;  %v1212_v59 = vadd.f32 %v1151_v56, %v2971_v38  ;;  %v1153_v60 = vpop.f32.mrb[35].mxu0 }
 0x181   : > { %v1235_v61 = vadd.f32 %v3004_v52, %v1212_v59  ;;  %v1250_v62 = vmax.f32 %v1234_v57, 0.0 }
 0x183   : > { %v1251_v1 = vmax.f32 %v1235_v61, 0.0 }
 0x184   : > { %v1156_v2 = vpop.f32.mrb[36].mxu0 }
 0x185   : > { %v1266_v3 = vpack.c.bf16 %v1251_v1, %v1250_v62  ;;  %v1213_v4 = vadd.f32 %v1156_v2, %v2973_v43  ;;  %v1158_v6 = vpop.f32.mrb[37].mxu0 }
 0x186   : > { %v1159_v7 = vpop.f32.mrb[38].mxu0 }
 0x187   : > { %v1236_v8 = vadd.f32 %v3004_v52, %v1213_v4  ;;  %v1214_v33 = vadd.f32 %v1159_v7, %v2975_v48  ;;  %v1161_v9 = vpop.f32.mrb[39].mxu0  ;;  %2159 = vmatmul.mubr.msk.bf16.vlgmr.msra.gmra.mrb[32].mxu1 %vm512_vm0, %v1266_v3 }
 0x188   : > { %1400 = vmatprep.mubr.bf16.mxu1 %v2553_v0 }
 0x189   : > { %v1237_v38 = vadd.f32 %v3004_v52, %v1214_v33  ;;  %v1252_v11 = vmax.f32 %v1236_v8, 0.0 }
 0x18b   : > { %v1253_v12 = vmax.f32 %v1237_v38, 0.0 }
 0x18c   : > { %v1164_v13 = vpop.f32.mrb[40].mxu0 }
 0x18d   : > { %v1267_v14 = vpack.c.bf16 %v1253_v12, %v1252_v11  ;;  %v1215_v16 = vadd.f32 %v1164_v13, %v2977_v53  ;;  %v1166_v43 = vpop.f32.mrb[41].mxu0 }
 0x18e   : > { %v1167_v17 = vpop.f32.mrb[42].mxu0 }
 0x18f   : > { %v1238_v18 = vadd.f32 %v3004_v52, %v1215_v16  ;;  %v1216_v19 = vadd.f32 %v1167_v17, %v2979_v58  ;;  %v1169_v48 = vpop.f32.mrb[43].mxu0  ;;  %2160 = vmatmul.mubr.msk.bf16.gmra.mrb[36].mxu1 %vm512_vm0, %v1267_v14 }
 0x190   : > { %1410 = vmatprep.mubr.bf16.mxu1 %v2553_v0  ;;  %v1284_v48 = vlaneseq }
 0x191   : > { %v1239_v21 = vadd.f32 %v3004_v52, %v1216_v19  ;;  %v1254_v22 = vmax.f32 %v1238_v18, 0.0 }
 0x193   : > { %v1255_v23 = vmax.f32 %v1239_v21, 0.0  ;;  %v1285_v21 = vshrl.u32 %v1284_v48, 7 }
 0x194   : > { %v1172_v24 = vpop.f32.mrb[44].mxu0 }
 0x195   : > { %v1268_v26 = vpack.c.bf16 %v1255_v23, %v1254_v22  ;;  %v1217_v27 = vadd.f32 %v1172_v24, %v2981_v63  ;;  %v1174_v53 = vpop.f32.mrb[45].mxu0  ;;  %v1286_v22 = vsub.s32 0, %v1285_v21  ;;  %v1290_v23 = vsub.s32 1, %v1285_v21 }
 0x196   : > { %v1175_v28 = vpop.f32.mrb[46].mxu0 }
 0x197   : > { %v1240_v29 = vadd.f32 %v3004_v52, %v1217_v27  ;;  %v1218_v31 = vadd.f32 %v1175_v28, %v2983_v5  ;;  %v1177_v58 = vpop.f32.mrb[47].mxu0  ;;  %2161 = vmatmul.mubr.msk.bf16.gmra.mrb[40].mxu1 %vm512_vm0, %v1268_v26  ;;  %v2554_v26 = vmov 0.0  }
 0x198   : > { %1420 = vmatprep.mubr.bf16.mxu1 %v2553_v0 }
 0x199   : > { %v1241_v32 = vadd.f32 %v3004_v52, %v1218_v31  ;;  %v1256_v34 = vmax.f32 %v1240_v29, 0.0 }
 0x19b   : > { %v1257_v35 = vmax.f32 %v1241_v32, 0.0 }
 0x19c   : > { %v1180_v37 = vpop.f32.mrb[48].mxu0 }
 0x19d   : > { %v1269_v39 = vpack.c.bf16 %v1257_v35, %v1256_v34  ;;  %v1219_v40 = vadd.f32 %v1180_v37, %v2985_v10  ;;  %v1182_v63 = vpop.f32.mrb[49].mxu0 }
 0x19e   : > { %v1183_v41 = vpop.f32.mrb[50].mxu0 }
 0x19f   : > { %v1242_v44 = vadd.f32 %v3004_v52, %v1219_v40  ;;  %v1220_v45 = vadd.f32 %v1183_v41, %v2987_v15  ;;  %v1185_v5 = vpop.f32.mrb[51].mxu0  ;;  %2162 = vmatmul.mubr.msk.bf16.gmra.mrb[44].mxu1 %vm512_vm0, %v1269_v39 }
 0x1a0   : > { %1430 = vmatprep.mubr.bf16.mxu1 %v2553_v0 }
 0x1a1   : > { %v1243_v46 = vadd.f32 %v3004_v52, %v1220_v45  ;;  %v1258_v47 = vmax.f32 %v1242_v44, 0.0 }
 0x1a3   : > { %v1259_v50 = vmax.f32 %v1243_v46, 0.0 }
 0x1a4   : > { %v1188_v51 = vpop.f32.mrb[52].mxu0 }
 0x1a5   : > { %v1270_v54 = vpack.c.bf16 %v1259_v50, %v1258_v47  ;;  %v1221_v55 = vadd.f32 %v1188_v51, %v2989_v20  ;;  %v1190_v10 = vpop.f32.mrb[53].mxu0  ;;  %v1471_v47 = vld [vmem:[%s2701_s13] sm:$0xff]  ;;  %v3094_v51 = vld [vmem:[%s2701_s13 + $0x10] sm:$0xff] }
 0x1a6   : > { %v1191_v56 = vpop.f32.mrb[54].mxu0 }
 0x1a7   : > { %v1244_v57 = vadd.f32 %v3004_v52, %v1221_v55  ;;  %v1222_v59 = vadd.f32 %v1191_v56, %v2991_v25  ;;  %v1193_v15 = vpop.f32.mrb[55].mxu0  ;;  %2163 = vmatmul.mubr.msk.bf16.gmra.mrb[48].mxu1 %vm512_vm0, %v1270_v54 }
 0x1a8   : > { %1440 = vmatprep.mubr.bf16.mxu1 %v2553_v0 }
 0x1a9   : > { %v1245_v60 = vadd.f32 %v3004_v52, %v1222_v59  ;;  %v1260_v61 = vmax.f32 %v1244_v57, 0.0 }
 0x1ab   : > { %v1261_v62 = vmax.f32 %v1245_v60, 0.0 }
 0x1ac   : > { %v1196_v1 = vpop.f32.mrb[56].mxu0 }
 0x1ad   : > { %v1271_v2 = vpack.c.bf16 %v1261_v62, %v1260_v61  ;;  %v1223_v3 = vadd.f32 %v1196_v1, %v2993_v30  ;;  %v1198_v20 = vpop.f32.mrb[57].mxu0  ;;  %v1472_v61 = vld [vmem:[%s2701_s13 + $0x8] sm:$0xff] }
 0x1ae   : > { %v1199_v4 = vpop.f32.mrb[58].mxu0 }
 0x1af   : > { %v1246_v6 = vadd.f32 %v3004_v52, %v1223_v3  ;;  %v1224_v7 = vadd.f32 %v1199_v4, %v2995_v36  ;;  %v1201_v25 = vpop.f32.mrb[59].mxu0  ;;  %2164 = vmatmul.mubr.msk.bf16.gmra.mrb[52].mxu1 %vm512_vm0, %v1271_v2  ;;  %v1474_v4 = vld [vmem:[%s2701_s13 + $0x18] sm:$0xff] }
 0x1b0   : > { %1450 = vmatprep.mubr.bf16.mxu1 %v2553_v0  ;;  %v3114_v25 = vld [vmem:[%s2701_s13 + $0x20] sm:$0xff] }
 0x1b1   : > { %v1247_v8 = vadd.f32 %v3004_v52, %v1224_v7  ;;  %v1262_v33 = vmax.f32 %v1246_v6, 0.0 }
 0x1b3   : > { %v1263_v9 = vmax.f32 %v1247_v8, 0.0 }
 0x1b4   : > { %v1204_v38 = vpop.f32.mrb[60].mxu0 }
 0x1b5   : > { %v1272_v11 = vpack.c.bf16 %v1263_v9, %v1262_v33  ;;  %v1225_v12 = vadd.f32 %v1204_v38, %v2997_v42  ;;  %v1206_v30 = vpop.f32.mrb[61].mxu0  ;;  %v3053_v42 = vand.u32 127, %v1284_v48 }
 0x1b6   : > { %v1207_v13 = vpop.f32.mrb[62].mxu0 }
 0x1b7   : > { %v1248_v14 = vadd.f32 %v3004_v52, %v1225_v12  ;;  %v1226_v16 = vadd.f32 %v1207_v13, %v2999_v49  ;;  %v1209_v36 = vpop.f32.mrb[63].mxu0  ;;  %2165 = vmatmul.mubr.msk.bf16.gmra.mrb[56].mxu1 %vm512_vm0, %v1272_v11  ;;  %vm1508_vm1 = vcmp.ge.s32.totalorder %v3053_v42, 63  ;;  %vm1510_vm2 = vcmp.lt.s32.totalorder %v3053_v42, 81  ;;  %v3121_v12 = vld [vmem:[%s2701_s13 + $0x30] sm:$0xff] }
 0x1b8   : > { %1460 = vmatprep.mubr.bf16.mxu1 %v2553_v0  ;;  %v1505_v49 = vadd.s32 128, %v3053_v42  ;;  %v1282_v0 = vld [vmem:[%s3602_s4] sm:$0x3]  ;;  %vm3061_vm3 = vmand %vm1508_vm1, %vm1510_vm2  ;;  %vm1506_vm6 = vcmp.lt.s32.totalorder %v3053_v42, 9  ;;  %vm1878_vm8 = vcmp.ge.s32.totalorder %v3053_v42, 45  ;;  %vm1879_vm9 = vcmp.lt.s32.totalorder %v3053_v42, 63 }
 0x1b9   : > { %v1249_v43 = vadd.f32 %v3004_v52, %v1226_v16  ;;  %v1264_v17 = vmax.f32 %v1248_v14, 0.0  ;;  %v3065_v24 = vrot.slane %v1282_v0, %v1286_v22  ;;  %v1522_v27 = vsel %vm3061_vm3, 1.0, %v2554_v26  ;;  %vm3185_vm10 = vmand %vm1878_vm8, %vm1879_vm9 }
 0x1ba   : > { %vm1515_vm4 = vcmp.ge.s32.totalorder %v1505_v49, 173  ;;  %vm1517_vm5 = vcmp.lt.s32.totalorder %v1505_v49, 191  ;;  %v3070_v53 = vrot.slane %v1282_v0, %v1290_v23  ;;  %v3074_v29 = vsel %vm1506_vm6, -1.0, %v1522_v27 }
 0x1bb   : > { %v1265_v18 = vmax.f32 %v1249_v43, 0.0  ;;  %vm1519_vm7 = vmand %vm1515_vm4, %vm1517_vm5 }
 0x1bc   : > { %v3079_v32 = vsel %vm1519_vm7, 1.0, %v2554_v26 }
 0x1bd   : > { %v1273_v19 = vpack.c.bf16 %v1265_v18, %v1264_v17 }
 0x1bf   : > { %2166 = vmatmul.mubr.msk.bf16.gmra.mrb[60].mxu1 %vm512_vm0, %v1273_v19  ;;  %v3130_v19 = vld [vmem:[%s2701_s13 + $0x40] sm:$0xff] }
 0x25a   : > { %v1392_v28 = vpop.f32.mrb[32].mxu1 }
 0x25b   : > { %v3077_v31 = vadd.f32 %v1392_v28, %v3065_v24  ;;  %v1394_v58 = vpop.f32.mrb[33].mxu1 }
 0x25c   : > { %v1395_v34 = vadd.f32 %v1394_v58, %v3070_v53  ;;  %v1396_v35 = vpop.f32.mrb[34].mxu1 }
 0x25d   : > { %v1526_v37 = vmul.f32 %v3074_v29, %v3077_v31  ;;  %v3085_v39 = vadd.f32 %v1396_v35, %v3065_v24  ;;  %v1398_v40 = vpop.f32.mrb[35].mxu1  ;;  %v1702_v57 = vmul.f32 %v1471_v47, %v3077_v31 }
 0x25e   : > { %v1527_v63 = vmul.f32 %v3079_v32, %v1395_v34  ;;  %v1399_v41 = vadd.f32 %v1398_v40, %v3070_v53  ;;  %v1734_v59 = vmul.f32 %v1471_v47, %v1395_v34 }
 0x25f   : > { %v1558_v44 = vmul.f32 1.442695, %v1526_v37  ;;  %v1528_v45 = vmul.f32 %v3074_v29, %v3085_v39  ;;  %v1703_v62 = vmul.f32 %v3094_v51, %v3085_v39  ;;  %v3118_v9 = vadd.f32 %v1702_v57, %v1472_v61  ;;  %v1476_v37 = vld [vmem:[%s2701_s13 + $0x28] sm:$0xff] }
 0x260   : > { %v1560_v5 = vmul.f32 1.442695, %v1527_v63  ;;  %v1529_v46 = vmul.f32 %v3079_v32, %v1399_v41  ;;  %v1735_v1 = vmul.f32 %v3094_v51, %v1399_v41  ;;  %v1750_v38 = vadd.f32 %v1734_v59, %v1472_v61  ;;  %v1480_v61 = vld [vmem:[%s2701_s13 + $0x48] sm:$0xff] }
 0x261   : > { %2356 = vpow2.f32 %v1558_v44  ;;  %v1562_v50 = vmul.f32 1.442695, %v1528_v45  ;;  %v3124_v13 = vadd.f32 %v1703_v62, %v1474_v4 }
 0x262   : > { %2358 = vpow2.f32 %v1560_v5  ;;  %v1564_v54 = vmul.f32 1.442695, %v1529_v46  ;;  %v1402_v55 = vpop.f32.mrb[36].mxu1  ;;  %v1751_v14 = vadd.f32 %v1735_v1, %v1474_v4 }
 0x263   : > { %2360 = vpow2.f32 %v1562_v50  ;;  %v3097_v10 = vadd.f32 %v1402_v55, %v3065_v24  ;;  %v1404_v56 = vpop.f32.mrb[37].mxu1  ;;  %v1478_v55 = vld [vmem:[%s2701_s13 + $0x38] sm:$0xff] }
 0x264   : > { %2362 = vpow2.f32 %v1564_v54  ;;  %v1405_v15 = vadd.f32 %v1404_v56, %v3070_v53  ;;  %v1406_v60 = vpop.f32.mrb[38].mxu1 }
 0x265   : > { %v1530_v2 = vmul.f32 %v3074_v29, %v3097_v10  ;;  %v3108_v3 = vadd.f32 %v1406_v60, %v3065_v24  ;;  %v1408_v20 = vpop.f32.mrb[39].mxu1  ;;  %v1704_v36 = vmul.f32 %v3114_v25, %v3097_v10 }
 0x266   : > { %v1531_v6 = vmul.f32 %v3079_v32, %v1405_v15  ;;  %v1409_v7 = vadd.f32 %v1408_v20, %v3070_v53  ;;  %v1736_v43 = vmul.f32 %v3114_v25, %v1405_v15 }
 0x267   : > { %v1566_v8 = vmul.f32 1.442695, %v1530_v2  ;;  %v1532_v33 = vmul.f32 %v3074_v29, %v3108_v3  ;;  %v1705_v21 = vmul.f32 %v3121_v12, %v3108_v3  ;;  %v3153_v60 = vadd.f32 %v1704_v36, %v1476_v37 }
 0x268   : > { %v1568_v11 = vmul.f32 1.442695, %v1531_v6  ;;  %v1533_v30 = vmul.f32 %v3079_v32, %v1409_v7  ;;  %v1737_v49 = vmul.f32 %v3121_v12, %v1409_v7  ;;  %v1752_v4 = vadd.f32 %v1736_v43, %v1476_v37 }
 0x269   : > { %2364 = vpow2.f32 %v1566_v8  ;;  %v1570_v16 = vmul.f32 1.442695, %v1532_v33  ;;  %v3159_v6 = vadd.f32 %v1705_v21, %v1478_v55 }
 0x26a   : > { %2366 = vpow2.f32 %v1568_v11  ;;  %v1572_v17 = vmul.f32 1.442695, %v1533_v30  ;;  %v1412_v18 = vpop.f32.mrb[40].mxu1 }
 0x26b   : > { %v2357_v48 = vpop.eup %2356  ;;  %2368 = vpow2.f32 %v1570_v16  ;;  %v3136_v22 = vadd.f32 %v1412_v18, %v3065_v24  ;;  %v1414_v0 = vpop.f32.mrb[41].mxu1 }
 0x26c   : > { %v2359_v23 = vpop.eup %2358  ;;  %v1622_v26 = vadd.f32 1.0, %v2357_v48  ;;  %v1670_v27 = vmul.f32 %v2357_v48, %v1471_v47  ;;  %2370 = vpow2.f32 %v1572_v17  ;;  %v1415_v28 = vadd.f32 %v1414_v0, %v3070_v53  ;;  %v1416_v58 = vpop.f32.mrb[42].mxu1 }
 0x26d   : > { %v2361_v34 = vpop.eup %2360  ;;  %v1686_v35 = vmul.f32 %v2359_v23, %v1471_v47  ;;  %v1534_v40 = vmul.f32 %v3074_v29, %v3136_v22  ;;  %v1706_v63 = vmul.f32 %v3130_v19, %v3136_v22  ;;  %v3147_v41 = vadd.f32 %v1416_v58, %v3065_v24  ;;  %v1418_v44 = vpop.f32.mrb[43].mxu1 }
 0x26e   : > { %v2363_v45 = vpop.eup %2362  ;;  %2372 = vrcp.f32 %v1622_v26  ;;  %v1814_v5 = vmul.f32 0.5, %v1670_v27  ;;  %v1623_v46 = vadd.f32 1.0, %v2361_v34  ;;  %v1671_v50 = vmul.f32 %v2361_v34, %v3094_v51 }
 0x26f   : > { %v1766_v54 = vmul.f32 0.5, %v1686_v35  ;;  %v1687_v47 = vmul.f32 %v2363_v45, %v3094_v51  ;;  %v1574_v56 = vmul.f32 1.442695, %v1534_v40  ;;  %v1535_v57 = vmul.f32 %v3079_v32, %v1415_v28 }
 0x270   : > { %v1830_v59 = vadd.f32 %v1814_v5, %v1750_v38  ;;  %2374 = vrcp.f32 %v1623_v46  ;;  %v1815_v15 = vmul.f32 0.5, %v1671_v50  ;;  %v1536_v51 = vmul.f32 %v3074_v29, %v3147_v41 }
 0x271   : > { %v1782_v62 = vsub.f32 %v3118_v9, %v1766_v54  ;;  %v1767_v1 = vmul.f32 0.5, %v1687_v47  ;;  %2376 = vpow2.f32 %v1574_v56  ;;  %v1576_v2 = vmul.f32 1.442695, %v1535_v57 }
 0x272   : > { %v3157_v20 = vadd.f32 %v1815_v15, %v1751_v14  ;;  %v3163_v7 = vpop.f32.mrb[44].mxu1  ;;  %v1753_v38 = vadd.f32 %v1737_v49, %v1478_v55  ;;  %v3166_v9 = vadd.f32 %v1706_v63, %v1480_v61  ;;  %v1846_v14 = vmin.f32 %v1830_v59, 256.0 }
 0x273   : > { %v2365_v8 = vpop.eup %2364  ;;  %v1783_v33 = vsub.f32 %v3124_v13, %v1767_v1  ;;  %2378 = vpow2.f32 %v1576_v2  ;;  %v3168_v11 = vpop.f32.mrb[45].mxu1  ;;  %v1738_v43 = vmul.f32 %v3130_v19, %v1415_v28  ;;  %v1798_v48 = vmax.f32 %v1782_v62, 0.0  ;;  %v3174_v13 = vld [vmem:[%s2701_s13 + $0x50] sm:$0xff] }
 0x274   : > { %v2367_v30 = vpop.eup %2366  ;;  %v1624_v16 = vadd.f32 1.0, %v2365_v8  ;;  %v1672_v36 = vmul.f32 %v2365_v8, %v3114_v25  ;;  %v1426_v17 = vpop.f32.mrb[46].mxu1  ;;  %v1578_v49 = vmul.f32 1.442695, %v1536_v51  ;;  %v1419_v0 = vadd.f32 %v1418_v44, %v3070_v53 }
 0x275   : > { %v2369_v18 = vpop.eup %2368  ;;  %v1688_v21 = vmul.f32 %v2367_v30, %v3114_v25  ;;  %v3177_v23 = vpop.f32.mrb[47].mxu1  ;;  %v3193_v45 = vmul.f32 %v3174_v13, %v3147_v41  ;;  %v1799_v55 = vmax.f32 %v1783_v33, 0.0  ;;  %v1847_v56 = vmin.f32 %v3157_v20, 256.0  ;;  %v1482_v30 = vld [vmem:[%s2701_s13 + $0x58] sm:$0xff] }
 0x276   : > { %v2371_v26 = vpop.eup %2370  ;;  %2380 = vrcp.f32 %v1624_v16  ;;  %v1816_v27 = vmul.f32 0.5, %v1672_v36  ;;  %v1625_v58 = vadd.f32 1.0, %v2369_v18  ;;  %v1673_v34 = vmul.f32 %v2369_v18, %v3121_v12 }
 0x277   : > { %v1768_v28 = vmul.f32 0.5, %v1688_v21  ;;  %v1689_v35 = vmul.f32 %v2371_v26, %v3121_v12  ;;  %2382 = vpow2.f32 %v1578_v49  ;;  %v1537_v37 = vmul.f32 %v3079_v32, %v1419_v0 }
 0x278   : > { %v2373_v40 = vpop.eup %2372  ;;  %v1832_v63 = vadd.f32 %v1816_v27, %v1752_v4  ;;  %2384 = vrcp.f32 %v1625_v58  ;;  %v1817_v44 = vmul.f32 0.5, %v1673_v34  ;;  %v1754_v1 = vadd.f32 %v1738_v43, %v1480_v61 }
 0x279   : > { %v1862_v5 = vsel %vm1506_vm6, %v2373_v40, %v3077_v31  ;;  %v1784_v46 = vsub.f32 %v3153_v60, %v1768_v28  ;;  %v1769_v50 = vmul.f32 0.5, %v1689_v35  ;;  %v1580_v12 = vmul.f32 1.442695, %v1537_v37  ;;  %v3243_v28 = vld [vmem:[%s2701_s13 + $0x60] sm:$0xff] }
 0x27a   : > { %v2375_v54 = vpop.eup %2374  ;;  %v1881_v47 = vsel %vm3185_vm10, %v1798_v48, %v1862_v5  ;;  %v1833_v57 = vadd.f32 %v1817_v44, %v1753_v38  ;;  %v1432_v59 = vpop.f32.mrb[48].mxu1  ;;  %v1739_v8 = vmul.f32 %v3174_v13, %v1419_v0  ;;  %v1848_v38 = vmin.f32 %v1832_v63, 256.0 }
 0x27b   : > { %v2377_v15 = vpop.eup %2376  ;;  %v1897_v62 = vsel %vm3061_vm3, %v1846_v14, %v1881_v47  ;;  %v1863_v31 = vsel %vm1506_vm6, %v2375_v54, %v3085_v39  ;;  %v1785_v60 = vsub.f32 %v3159_v6, %v1769_v50  ;;  %v3208_v2 = vpop.f32.mrb[49].mxu1  ;;  %v1800_v33 = vmax.f32 %v1784_v46, 0.0 }
 0x27c   : > { %1913 = vst [vmem:[%s3212_s8] sm:$0xff] %v1897_v62  ;;  %v1882_v20 = vsel %vm3185_vm10, %v1799_v55, %v1863_v31  ;;  %v1626_v4 = vadd.f32 1.0, %v2377_v15  ;;  %v1674_v51 = vmul.f32 %v2377_v15, %v3130_v19  ;;  %v3219_v39 = vpop.f32.mrb[50].mxu1  ;;  %2386 = vpow2.f32 %v1580_v12  ;;  %v3277_v15 = vld [vmem:[%s2701_s13 + $0x70] sm:$0xff] }
 0x27d   : > { %v2379_v6 = vpop.eup %2378  ;;  %v1898_v61 = vsel %vm3061_vm3, %v1847_v56, %v1882_v20  ;;  %v3224_v14 = vpop.f32.mrb[51].mxu1  ;;  %v3230_v43 = vadd.f32 %v3163_v7, %v3065_v24  ;;  %v1801_v18 = vmax.f32 %v1785_v60, 0.0  ;;  %v1849_v48 = vmin.f32 %v1833_v57, 256.0  ;;  %v1484_v60 = vld [vmem:[%s2701_s13 + $0x68] sm:$0xff] }
 0x27e   : > { %1914 = vst [vmem:[%s3212_s8 + $0x8] sm:$0xff] %v1898_v61  ;;  %2388 = vrcp.f32 %v1626_v4  ;;  %v1690_v16 = vmul.f32 %v2379_v6, %v3130_v19  ;;  %v1818_v36 = vmul.f32 0.5, %v1674_v51  ;;  %v1425_v21 = vadd.f32 %v3168_v11, %v3070_v53 }
 0x27f   : > { %v3235_v49 = vadd.f32 %v1426_v17, %v3065_v24  ;;  %v1755_v58 = vadd.f32 %v1739_v8, %v1482_v30  ;;  %v1538_v19 = vmul.f32 %v3074_v29, %v3230_v43  ;;  %v1429_v17 = vadd.f32 %v3177_v23, %v3070_v53 }
 0x280   : > { %v2381_v0 = vpop.eup %2380  ;;  %v1770_v26 = vmul.f32 0.5, %v1690_v16  ;;  %v1834_v27 = vadd.f32 %v1818_v36, %v1754_v1  ;;  %v1539_v11 = vmul.f32 %v3079_v32, %v1425_v21  ;;  %v3249_v35 = vadd.f32 %v1432_v59, %v3065_v24 }
 0x281   : > { %v2383_v34 = vpop.eup %2382  ;;  %v1864_v7 = vsel %vm1506_vm6, %v2381_v0, %v3097_v10  ;;  %v1540_v10 = vmul.f32 %v3074_v29, %v3235_v49  ;;  %v1582_v12 = vmul.f32 1.442695, %v1538_v19  ;;  %v1708_v47 = vmul.f32 %v3243_v28, %v3230_v43 }
 0x282   : > { %v2385_v37 = vpop.eup %2384  ;;  %v1883_v40 = vsel %vm3185_vm10, %v1800_v33, %v1864_v7  ;;  %v1786_v63 = vsub.f32 %v3166_v9, %v1770_v26  ;;  %v1627_v44 = vadd.f32 1.0, %v2383_v34  ;;  %v3256_v5 = vpop.f32.mrb[52].mxu1  ;;  %v1675_v50 = vmul.f32 %v2383_v34, %v3174_v13  ;;  %v3299_v26 = vld [vmem:[%s2701_s13 + $0x80] sm:$0xff] }
 0x283   : > { %v1899_v46 = vsel %vm3061_vm3, %v1848_v38, %v1883_v40  ;;  %v1865_v23 = vsel %vm1506_vm6, %v2385_v37, %v3108_v3  ;;  %v3264_v9 = vpop.f32.mrb[53].mxu1  ;;  %v1584_v55 = vmul.f32 1.442695, %v1539_v11  ;;  %v1740_v59 = vmul.f32 %v3243_v28, %v1425_v21 }
 0x284   : > { %1915 = vst [vmem:[%s3212_s8 + $0x10] sm:$0xff] %v1899_v46  ;;  %v1884_v54 = vsel %vm3185_vm10, %v1801_v18, %v1865_v23  ;;  %2390 = vrcp.f32 %v1627_v44  ;;  %v3271_v56 = vpop.f32.mrb[54].mxu1  ;;  %v1819_v57 = vmul.f32 0.5, %v1675_v50  ;;  %v1723_v31 = vadd.f32 %v3193_v45, %v1482_v30  ;;  %v1486_v18 = vld [vmem:[%s2701_s13 + $0x78] sm:$0xff] }
 0x285   : > { %v1900_v3 = vsel %vm3061_vm3, %v1849_v48, %v1884_v54  ;;  %2392 = vpow2.f32 %v1582_v12  ;;  %v3279_v62 = vpop.f32.mrb[55].mxu1  ;;  %v1586_v1 = vmul.f32 1.442695, %v1540_v10  ;;  %v1850_v4 = vmin.f32 %v1834_v27, 256.0 }
 0x286   : > { %1916 = vst [vmem:[%s3212_s8 + $0x18] sm:$0xff] %v1900_v3  ;;  %2394 = vpow2.f32 %v1584_v55  ;;  %v2387_v20 = vpop.eup %2386  ;;  %v1835_v51 = vadd.f32 %v1819_v57, %v1755_v58  ;;  %v1541_v8 = vmul.f32 %v3079_v32, %v1429_v17  ;;  %v1542_v6 = vmul.f32 %v3074_v29, %v3249_v35  ;;  %v3337_v3 = vld [vmem:[%s2701_s13 + $0x90] sm:$0xff] }
 0x287   : > { %v1802_v33 = vmax.f32 %v1786_v63, 0.0  ;;  %v1691_v38 = vmul.f32 %v2387_v20, %v3174_v13  ;;  %2396 = vpow2.f32 %v1586_v1  ;;  %v1709_v45 = vmul.f32 %v3277_v15, %v3235_v49 }
 0x288   : > { %v2389_v61 = vpop.eup %2388  ;;  %v3293_v16 = vadd.f32 %v1708_v47, %v1484_v60  ;;  %v1756_v36 = vadd.f32 %v1740_v59, %v1484_v60  ;;  %v1588_v48 = vmul.f32 1.442695, %v1541_v8  ;;  %v1590_v13 = vmul.f32 1.442695, %v1542_v6 }
 0x289   : > { %v1866_v30 = vsel %vm1506_vm6, %v2389_v61, %v3136_v22  ;;  %v1771_v0 = vmul.f32 0.5, %v1691_v38  ;;  %v1435_v27 = vadd.f32 %v3208_v2, %v3070_v53  ;;  %v1741_v19 = vmul.f32 %v3277_v15, %v1429_v17 }
 0x28a   : > { %v1885_v21 = vsel %vm3185_vm10, %v1802_v33, %v1866_v30  ;;  %v3303_v58 = vpop.f32.mrb[56].mxu1  ;;  %2398 = vpow2.f32 %v1588_v48  ;;  %v3310_v34 = vadd.f32 %v3219_v39, %v3065_v24  ;;  %v3315_v37 = vadd.f32 %v1709_v45, %v1486_v18 }
 0x28b   : > { %v1901_v22 = vsel %vm3061_vm3, %v1850_v4, %v1885_v21  ;;  %v3312_v7 = vpop.f32.mrb[57].mxu1  ;;  %v1787_v11 = vsub.f32 %v1723_v31, %v1771_v0  ;;  %2400 = vpow2.f32 %v1590_v13  ;;  %v1543_v2 = vmul.f32 %v3079_v32, %v1435_v27  ;;  %v1490_v0 = vld [vmem:[%s2701_s13 + $0x98] sm:$0xff] }
 0x28c   : > { %1917 = vst [vmem:[%s3212_s8 + $0x20] sm:$0xff] %v1901_v22  ;;  %v3318_v40 = vpop.f32.mrb[58].mxu1  ;;  %v1851_v63 = vmin.f32 %v1835_v51, 256.0  ;;  %v1710_v17 = vmul.f32 %v3299_v26, %v3249_v35  ;;  %v1544_v39 = vmul.f32 %v3074_v29, %v3310_v34  ;;  %v1439_v44 = vadd.f32 %v3224_v14, %v3070_v53 }
 0x28d   : > { %v3326_v10 = vpop.f32.mrb[59].mxu1  ;;  %v1803_v23 = vmax.f32 %v1787_v11, 0.0  ;;  %v1592_v50 = vmul.f32 1.442695, %v1543_v2  ;;  %v1742_v12 = vmul.f32 %v3299_v26, %v1435_v27  ;;  %v3331_v54 = vadd.f32 %v3256_v5, %v3065_v24 }
 0x28e   : > { %v2391_v46 = vpop.eup %2390  ;;  %v1594_v14 = vmul.f32 1.442695, %v1544_v39  ;;  %v1545_v57 = vmul.f32 %v3079_v32, %v1439_v44  ;;  %v3342_v59 = vadd.f32 %v3264_v9, %v3070_v53  ;;  %v1711_v8 = vmul.f32 %v3337_v3, %v3310_v34 }
 0x28f   : > { %v2393_v47 = vpop.eup %2392  ;;  %v1867_v55 = vsel %vm1506_vm6, %v2391_v46, %v3147_v41  ;;  %2402 = vpow2.f32 %v1592_v50  ;;  %v1546_v6 = vmul.f32 %v3074_v29, %v3331_v54  ;;  %v1757_v21 = vadd.f32 %v1741_v19, %v1486_v18  ;;  %v3372_v50 = vld [vmem:[%s2701_s13 + $0xa0] sm:$0xff] }
 0x290   : > { %v2395_v31 = vpop.eup %2394  ;;  %v1886_v5 = vsel %vm3185_vm10, %v1803_v23, %v1867_v55  ;;  %v1628_v60 = vadd.f32 1.0, %v2393_v47  ;;  %v1676_v1 = vmul.f32 %v2393_v47, %v3243_v28  ;;  %2404 = vpow2.f32 %v1594_v14 }
 0x291   : > { %v1902_v41 = vsel %vm3061_vm3, %v1851_v63, %v1886_v5  ;;  %v1692_v20 = vmul.f32 %v2395_v31, %v3243_v28  ;;  %v1596_v4 = vmul.f32 1.442695, %v1545_v57  ;;  %v2397_v51 = vpop.eup %2396  ;;  %v1488_v28 = vld [vmem:[%s2701_s13 + $0x88] sm:$0xff]  ;;  %v1743_v13 = vmul.f32 %v3337_v3, %v1439_v44 }
 0x292   : > { %1918 = vst [vmem:[%s3212_s8 + $0x28] sm:$0xff] %v1902_v41  ;;  %2406 = vrcp.f32 %v1628_v60  ;;  %v1820_v9 = vmul.f32 0.5, %v1676_v1  ;;  %v3355_v61 = vpop.f32.mrb[60].mxu1  ;;  %v1629_v38 = vadd.f32 1.0, %v2397_v51  ;;  %v1677_v45 = vmul.f32 %v2397_v51, %v3277_v15 }
 0x293   : > { %v1772_v33 = vmul.f32 0.5, %v1692_v20  ;;  %2408 = vpow2.f32 %v1596_v4  ;;  %v3359_v30 = vpop.f32.mrb[61].mxu1  ;;  %v1598_v27 = vmul.f32 1.442695, %v1546_v6  ;;  %v1547_v39 = vmul.f32 %v3079_v32, %v3342_v59 }
 0x294   : > { %v1836_v48 = vadd.f32 %v1820_v9, %v1756_v36  ;;  %v3363_v22 = vpop.f32.mrb[62].mxu1  ;;  %v2399_v11 = vpop.eup %2398  ;;  %2410 = vrcp.f32 %v1629_v38  ;;  %v1821_v63 = vmul.f32 0.5, %v1677_v45  ;;  %v1726_v18 = vadd.f32 %v1710_v17, %v1488_v28 }
 0x295   : > { %v1788_v2 = vsub.f32 %v3293_v16, %v1772_v33  ;;  %v3368_v46 = vpop.f32.mrb[63].mxu1  ;;  %v2401_v23 = vpop.eup %2400  ;;  %v1693_v36 = vmul.f32 %v2399_v11, %v3277_v15  ;;  %v1758_v19 = vadd.f32 %v1742_v12, %v1488_v28  ;;  %2412 = vpow2.f32 %v1598_v27  ;;  %v1492_v11 = vld [vmem:[%s2701_s13 + $0xa8] sm:$0xff] }
 0x296   : > { %v1837_v44 = vadd.f32 %v1821_v63, %v1757_v21  ;;  %v1630_v47 = vadd.f32 1.0, %v2401_v23  ;;  %v1678_v55 = vmul.f32 %v2401_v23, %v3299_v26  ;;  %v3375_v16 = vadd.f32 %v1711_v8, %v1490_v0  ;;  %v1493_v23 = vld [vmem:[%s2701_s13 + $0xb0] sm:$0xff] }
 0x297   : > { %v1773_v14 = vmul.f32 0.5, %v1693_v36  ;;  %v1759_v57 = vadd.f32 %v1743_v13, %v1490_v0  ;;  %v1600_v31 = vmul.f32 1.442695, %v1547_v39  ;;  %v3379_v5 = vadd.f32 %v3271_v56, %v3065_v24 }
 0x298   : > { %2414 = vrcp.f32 %v1630_v47  ;;  %v1822_v15 = vmul.f32 0.5, %v1678_v55  ;;  %v3383_v17 = vmul.f32 %v3372_v50, %v3331_v54  ;;  %v1449_v12 = vadd.f32 %v3279_v62, %v3070_v53 }
 0x299   : > { %v2403_v60 = vpop.eup %2402  ;;  %v1852_v1 = vmin.f32 %v1836_v48, 256.0  ;;  %v1789_v41 = vsub.f32 %v3315_v37, %v1773_v14  ;;  %2416 = vpow2.f32 %v1600_v31  ;;  %v1548_v20 = vmul.f32 %v3074_v29, %v3379_v5 }
 0x29a   : > { %v2405_v4 = vpop.eup %2404  ;;  %v1804_v56 = vmax.f32 %v1788_v2, 0.0  ;;  %v1694_v51 = vmul.f32 %v2403_v60, %v3299_v26  ;;  %v1838_v9 = vadd.f32 %v1822_v15, %v1758_v19  ;;  %v1549_v8 = vmul.f32 %v3079_v32, %v1449_v12 }
 0x29b   : > { %v1631_v33 = vadd.f32 1.0, %v2405_v4  ;;  %v1679_v62 = vmul.f32 %v2405_v4, %v3337_v3  ;;  %v1744_v38 = vmul.f32 %v3372_v50, %v3342_v59  ;;  %v1602_v37 = vmul.f32 1.442695, %v1548_v20 }
 0x29c   : > { %v2407_v6 = vpop.eup %2406  ;;  %v1853_v26 = vmin.f32 %v1837_v44, 256.0  ;;  %v1774_v48 = vmul.f32 0.5, %v1694_v51  ;;  %v1604_v21 = vmul.f32 1.442695, %v1549_v8  ;;  %v1805_v63 = vmax.f32 %v1789_v41, 0.0 }
 0x29d   : > { %v2409_v45 = vpop.eup %2408  ;;  %v1868_v28 = vsel %vm1506_vm6, %v2407_v6, %v3230_v43  ;;  %2418 = vrcp.f32 %v1631_v33  ;;  %v1823_v27 = vmul.f32 0.5, %v1679_v62  ;;  %v1713_v60 = vmul.f32 %v1493_v23, %v3379_v5  ;;  %v3435_v62 = vld [vmem:[%s2701_s13 + $0xc0] sm:$0xff] }
 0x29e   : > { %v1887_v0 = vsel %vm3185_vm10, %v1804_v56, %v1868_v28  ;;  %v1695_v13 = vmul.f32 %v2409_v45, %v3337_v3  ;;  %v2411_v59 = vpop.eup %2410  ;;  %v1790_v39 = vsub.f32 %v1726_v18, %v1774_v48  ;;  %2420 = vpow2.f32 %v1602_v37 }
 0x29f   : > { %v1903_v2 = vsel %vm3061_vm3, %v1852_v1, %v1887_v0  ;;  %v2413_v43 = vpop.eup %2412  ;;  %v1869_v36 = vsel %vm1506_vm6, %v2411_v59, %v3235_v49  ;;  %v1839_v3 = vadd.f32 %v1823_v27, %v1759_v57  ;;  %2422 = vpow2.f32 %v1604_v21  ;;  %v1494_v1 = vld [vmem:[%s2701_s13 + $0xb8] sm:$0xff] }
 0x2a0   : > { %1919 = vst [vmem:[%s3212_s8 + $0x30] sm:$0xff] %v1903_v2  ;;  %v1775_v19 = vmul.f32 0.5, %v1695_v13  ;;  %v1888_v44 = vsel %vm3185_vm10, %v1805_v63, %v1869_v36  ;;  %v1632_v47 = vadd.f32 1.0, %v2413_v43  ;;  %v1680_v55 = vmul.f32 %v2413_v43, %v3372_v50 }
 0x2a1   : > { %v1760_v18 = vadd.f32 %v1744_v38, %v1492_v11  ;;  %v1904_v14 = vsel %vm3061_vm3, %v1853_v26, %v1888_v44  ;;  %v1806_v31 = vmax.f32 %v1790_v39, 0.0  ;;  %v3420_v41 = vadd.f32 %v3303_v58, %v3065_v24 }
 0x2a2   : > { %v1791_v15 = vsub.f32 %v3375_v16, %v1775_v19  ;;  %v2415_v49 = vpop.eup %2414  ;;  %1920 = vst [vmem:[%s3212_s8 + $0x38] sm:$0xff] %v1904_v14  ;;  %2424 = vrcp.f32 %v1632_v47  ;;  %v1824_v57 = vmul.f32 0.5, %v1680_v55  ;;  %v1455_v20 = vadd.f32 %v3312_v7, %v3070_v53  ;;  %v3462_v14 = vld [vmem:[%s2701_s13 + $0xd0] sm:$0xff] }
 0x2a3   : > { %v2417_v4 = vpop.eup %2416  ;;  %v1870_v16 = vsel %vm1506_vm6, %v2415_v49, %v3249_v35  ;;  %v1854_v56 = vmin.f32 %v1838_v9, 256.0  ;;  %v1745_v51 = vmul.f32 %v1493_v23, %v1449_v12  ;;  %v3429_v8 = vadd.f32 %v3318_v40, %v3065_v24 }
 0x2a4   : > { %v1889_v6 = vsel %vm3185_vm10, %v1806_v31, %v1870_v16  ;;  %v1696_v58 = vmul.f32 %v2417_v4, %v3372_v50  ;;  %v1840_v33 = vadd.f32 %v1824_v57, %v1760_v18  ;;  %v1550_v7 = vmul.f32 %v3074_v29, %v3420_v41  ;;  %v1498_v16 = vld [vmem:[%s2701_s13 + $0xd8] sm:$0xff] }
 0x2a5   : > { %v1905_v35 = vsel %vm3061_vm3, %v1854_v56, %v1889_v6  ;;  %v1728_v12 = vadd.f32 %v3383_v17, %v1492_v11  ;;  %v3442_v9 = vadd.f32 %v1713_v60, %v1494_v1  ;;  %v1551_v40 = vmul.f32 %v3079_v32, %v1455_v20 }
 0x2a6   : > { %1921 = vst [vmem:[%s3212_s8 + $0x40] sm:$0xff] %v1905_v35  ;;  %v1855_v38 = vmin.f32 %v1839_v3, 256.0  ;;  %v1776_v37 = vmul.f32 0.5, %v1696_v58  ;;  %v1606_v45 = vmul.f32 1.442695, %v1550_v7  ;;  %v1552_v50 = vmul.f32 %v3074_v29, %v3429_v8 }
 0x2a7   : > { %v2419_v28 = vpop.eup %2418  ;;  %v1807_v26 = vmax.f32 %v1791_v15, 0.0  ;;  %v1761_v48 = vadd.f32 %v1745_v51, %v1494_v1  ;;  %v1714_v21 = vmul.f32 %v3435_v62, %v3420_v41  ;;  %v1608_v0 = vmul.f32 1.442695, %v1551_v40  ;;  %v1496_v1 = vld [vmem:[%s2701_s13 + $0xc8] sm:$0xff] }
 0x2a8   : > { %v2421_v17 = vpop.eup %2420  ;;  %v1871_v13 = vsel %vm1506_vm6, %v2419_v28, %v3310_v34  ;;  %v1792_v27 = vsub.f32 %v1728_v12, %v1776_v37  ;;  %2426 = vpow2.f32 %v1606_v45  ;;  %v1610_v11 = vmul.f32 1.442695, %v1552_v50 }
 0x2a9   : > { %v2423_v59 = vpop.eup %2422  ;;  %v1890_v2 = vsel %vm3185_vm10, %v1807_v26, %v1871_v13  ;;  %v1633_v63 = vadd.f32 1.0, %v2421_v17  ;;  %v1681_v39 = vmul.f32 %v2421_v17, %v1493_v23  ;;  %2428 = vpow2.f32 %v1608_v0 }
 0x2aa   : > { %v1906_v43 = vsel %vm3061_vm3, %v1855_v38, %v1890_v2  ;;  %v1697_v36 = vmul.f32 %v2423_v59, %v1493_v23  ;;  %v1746_v19 = vmul.f32 %v3435_v62, %v1455_v20  ;;  %2430 = vpow2.f32 %v1610_v11 }
 0x2ab   : > { %1922 = vst [vmem:[%s3212_s8 + $0x48] sm:$0xff] %v1906_v43  ;;  %v1856_v34 = vmin.f32 %v1840_v33, 256.0  ;;  %2432 = vrcp.f32 %v1633_v63  ;;  %v1825_v3 = vmul.f32 0.5, %v1681_v39  ;;  %v1459_v44 = vadd.f32 %v3326_v10, %v3070_v53 }
 0x2ac   : > { %v2425_v47 = vpop.eup %2424  ;;  %v1808_v55 = vmax.f32 %v1792_v27, 0.0  ;;  %v1777_v18 = vmul.f32 0.5, %v1697_v36  ;;  %v3466_v23 = vadd.f32 %v3355_v61, %v3065_v24  ;;  %v1465_v31 = vadd.f32 %v3359_v30, %v3070_v53  ;;  %v1499_v27 = vld [vmem:[%s2701_s13 + $0xe0] sm:$0xff]  ;;  %v1500_v36 = vld [vmem:[%s2701_s13 + $0xe8] sm:$0xff] }
 0x2ad   : > { %v1872_v15 = vsel %vm1506_vm6, %v2425_v47, %v3331_v54  ;;  %v1841_v60 = vadd.f32 %v1825_v3, %v1761_v48  ;;  %v1553_v10 = vmul.f32 %v3079_v32, %v1459_v44  ;;  %v3476_v49 = vadd.f32 %v3363_v22, %v3065_v24 }
 0x2ae   : > { %v1891_v57 = vsel %vm3185_vm10, %v1808_v55, %v1872_v15  ;;  %v1793_v61 = vsub.f32 %v3442_v9, %v1777_v18  ;;  %v1554_v30 = vmul.f32 %v3074_v29, %v3466_v23  ;;  %v1747_v4 = vmul.f32 %v3462_v14, %v1459_v44 }
 0x2af   : > { %v1907_v20 = vsel %vm3061_vm3, %v1856_v34, %v1891_v57  ;;  %v1612_v54 = vmul.f32 1.442695, %v1553_v10  ;;  %v1555_v24 = vmul.f32 %v3079_v32, %v1465_v31  ;;  %v1730_v22 = vadd.f32 %v1714_v21, %v1496_v1 }
 0x2b0   : > { %1923 = vst [vmem:[%s3212_s8 + $0x50] sm:$0xff] %v1907_v20  ;;  %v1614_v56 = vmul.f32 1.442695, %v1554_v30  ;;  %v1762_v51 = vadd.f32 %v1746_v19, %v1496_v1  ;;  %v1556_v6 = vmul.f32 %v3074_v29, %v3476_v49  ;;  %v1857_v33 = vmin.f32 %v1841_v60, 256.0  ;;  %v1501_v19 = vld [vmem:[%s2701_s13 + $0xf0] sm:$0xff] }
 0x2b1   : > { %2434 = vpow2.f32 %v1612_v54  ;;  %v1616_v7 = vmul.f32 1.442695, %v1555_v24  ;;  %v1469_v35 = vadd.f32 %v3368_v46, %v3070_v53  ;;  %v1763_v38 = vadd.f32 %v1747_v4, %v1498_v16 }
 0x2b2   : > { %v2427_v58 = vpop.eup %2426  ;;  %2436 = vpow2.f32 %v1614_v56  ;;  %v1618_v37 = vmul.f32 1.442695, %v1556_v6  ;;  %v1809_v50 = vmax.f32 %v1793_v61, 0.0  ;;  %v1716_v63 = vmul.f32 %v1499_v27, %v3466_v23 }
 0x2b3   : > { %v2429_v12 = vpop.eup %2428  ;;  %v1634_v9 = vadd.f32 1.0, %v2427_v58  ;;  %v1682_v40 = vmul.f32 %v2427_v58, %v3435_v62  ;;  %2438 = vpow2.f32 %v1616_v7  ;;  %v1557_v29 = vmul.f32 %v3079_v32, %v1469_v35  ;;  %v1502_v58 = vld [vmem:[%s2701_s13 + $0xf8] sm:$0xff]  ;;  %s2181_s13 = sshll.u32 %s2614_s25, 11  ;;  %s1930_s25 = scalar_lea.sflag [#allocation4], %s2697_s29 }
 0x2b4   : > { %v2431_v45 = vpop.eup %2430  ;;  %v1698_v28 = vmul.f32 %v2429_v12, %v3435_v62  ;;  %v1748_v39 = vmul.f32 %v1499_v27, %v1465_v31  ;;  %v1732_v60 = vadd.f32 %v1716_v63, %v1500_v36  ;;  %v1717_v57 = vmul.f32 %v1501_v19, %v3476_v49  ;;  %s3547_s15 = scalar_lea.hbm %s3604_s6, %s2181_s13 }
 0x2b5   : > { %v2433_v26 = vpop.eup %2432  ;;  %2440 = vrcp.f32 %v1634_v9  ;;  %v1826_v48 = vmul.f32 0.5, %v1682_v40  ;;  %v1635_v21 = vadd.f32 1.0, %v2431_v45  ;;  %v1683_v53 = vmul.f32 %v2431_v45, %v3462_v14 }
 0x2b6   : > { %v1873_v46 = vsel %vm1506_vm6, %v2433_v26, %v3379_v5  ;;  %v1778_v0 = vmul.f32 0.5, %v1698_v28  ;;  %2442 = vpow2.f32 %v1618_v37  ;;  %v1620_v17 = vmul.f32 1.442695, %v1557_v29 }
 0x2b7   : > { %v1892_v62 = vsel %vm3185_vm10, %v1809_v50, %v1873_v46  ;;  %v1842_v32 = vadd.f32 %v1826_v48, %v1762_v51  ;;  %2444 = vrcp.f32 %v1635_v21  ;;  %v1827_v13 = vmul.f32 0.5, %v1683_v53 }
 0x2b8   : > { %v1908_v11 = vsel %vm3061_vm3, %v1857_v33, %v1892_v62  ;;  %v1794_v59 = vsub.f32 %v1730_v22, %v1778_v0  ;;  %2446 = vpow2.f32 %v1620_v17  ;;  %v1715_v5 = vmul.f32 %v3462_v14, %v3429_v8 }
 0x2b9   : > { %1924 = vst [vmem:[%s3212_s8 + $0x58] sm:$0xff] %v1908_v11  ;;  %v1843_v2 = vadd.f32 %v1827_v13, %v1763_v38  ;;  %v1764_v10 = vadd.f32 %v1748_v39, %v1500_v36  ;;  %v1858_v54 = vmin.f32 %v1842_v32, 256.0  ;;  %v1733_v29 = vadd.f32 %v1717_v57, %v1502_v58 }
 0x2ba   : > { %v1731_v44 = vadd.f32 %v1715_v5, %v1498_v16  ;;  %v1810_v1 = vmax.f32 %v1794_v59, 0.0  ;;  %v1749_v16 = vmul.f32 %v1501_v19, %v1469_v35 }
 0x2bb   : > { %v2435_v43 = vpop.eup %2434  ;;  %v1859_v35 = vmin.f32 %v1843_v2, 256.0 }
 0x2bc   : > { %v2437_v34 = vpop.eup %2436  ;;  %v1699_v3 = vmul.f32 %v2435_v43, %v3462_v14  ;;  %v1765_v45 = vadd.f32 %v1749_v16, %v1502_v58 }
 0x2bd   : > { %v1636_v47 = vadd.f32 1.0, %v2437_v34  ;;  %v1684_v55 = vmul.f32 %v2437_v34, %v1499_v27  ;;  %v2439_v18 = vpop.eup %2438 }
 0x2be   : > { %v1779_v15 = vmul.f32 0.5, %v1699_v3  ;;  %v1700_v31 = vmul.f32 %v2439_v18, %v1499_v27 }
 0x2bf   : > { %v2441_v61 = vpop.eup %2440  ;;  %2448 = vrcp.f32 %v1636_v47  ;;  %v1828_v30 = vmul.f32 0.5, %v1684_v55 }
 0x2c0   : > { %v2443_v20 = vpop.eup %2442  ;;  %v1874_v14 = vsel %vm1506_vm6, %v2441_v61, %v3420_v41  ;;  %v1795_v4 = vsub.f32 %v1731_v44, %v1779_v15  ;;  %v1780_v22 = vmul.f32 0.5, %v1700_v31 }
 0x2c1   : > { %v2445_v56 = vpop.eup %2444  ;;  %v1893_v24 = vsel %vm3185_vm10, %v1810_v1, %v1874_v14  ;;  %v1844_v51 = vadd.f32 %v1828_v30, %v1764_v10  ;;  %v1637_v6 = vadd.f32 1.0, %v2443_v20  ;;  %v1685_v9 = vmul.f32 %v2443_v20, %v1501_v19 }
 0x2c2   : > { %v2447_v33 = vpop.eup %2446  ;;  %v1909_v7 = vsel %vm3061_vm3, %v1858_v54, %v1893_v24  ;;  %v1875_v41 = vsel %vm1506_vm6, %v2445_v56, %v3429_v8  ;;  %v1811_v12 = vmax.f32 %v1795_v4, 0.0  ;;  %v1796_v40 = vsub.f32 %v1732_v60, %v1780_v22 }
 0x2c3   : > { %1925 = vst [vmem:[%s3212_s8 + $0x60] sm:$0xff] %v1909_v7  ;;  %2450 = vrcp.f32 %v1637_v6  ;;  %v1701_v38 = vmul.f32 %v2447_v33, %v1501_v19  ;;  %v1829_v50 = vmul.f32 0.5, %v1685_v9  ;;  %v1860_v0 = vmin.f32 %v1844_v51, 256.0 }
 0x2c4   : > { %v1894_v37 = vsel %vm3185_vm10, %v1811_v12, %v1875_v41  ;;  %v1812_v53 = vmax.f32 %v1796_v40, 0.0 }
 0x2c5   : > { %v1910_v28 = vsel %vm3061_vm3, %v1859_v35, %v1894_v37  ;;  %v1781_v8 = vmul.f32 0.5, %v1701_v38  ;;  %v1845_v26 = vadd.f32 %v1829_v50, %v1765_v45 }
 0x2c6   : > { %1926 = vst [vmem:[%s3212_s8 + $0x68] sm:$0xff] %v1910_v28 }
 0x2c7   : > { %v1797_v48 = vsub.f32 %v1733_v29, %v1781_v8  ;;  %v1861_v11 = vmin.f32 %v1845_v26, 256.0 }
 0x2c9   : > { %v2449_v21 = vpop.eup %2448  ;;  %v1813_v13 = vmax.f32 %v1797_v48, 0.0 }
 0x2ca   : > { %v1876_v46 = vsel %vm1506_vm6, %v2449_v21, %v3466_v23 }
 0x2cb   : > { %v1895_v17 = vsel %vm3185_vm10, %v1812_v53, %v1876_v46 }
 0x2cc   : > { %v1911_v62 = vsel %vm3061_vm3, %v1860_v0, %v1895_v17 }
 0x2cd   : > { %v2451_v32 = vpop.eup %2450  ;;  %1927 = vst [vmem:[%s3212_s8 + $0x70] sm:$0xff] %v1911_v62 }
 0x2ce   : > { %v1877_v27 = vsel %vm1506_vm6, %v2451_v32, %v3476_v49 }
 0x2cf   : > { %v1896_v23 = vsel %vm3185_vm10, %v1813_v13, %v1877_v27 }
 0x2d0   : > { %v1912_v59 = vsel %vm3061_vm3, %v1861_v11, %v1896_v23 }
 0x2d1   : > { %1928 = vst [vmem:[%s3212_s8 + $0x78] sm:$0xff] %v1912_v59 }
 0x2d2   : > { %2495 = shalt.err (!%p2492_p2)
}
 0x2d3   : > { %s2496_s19 = scalar_lea.hbm %s3547_s15, 2048  ;;  %s2500_s11 = scalar_lea.hbm %s3604_s6, 4096 }
 0x2d4   : > { %p2497_p4 = scmp.ne.s32.totalorder %s3547_s15, %s2496_s19  ;;  %p2501_p9 = scmp.lt.u32.totalorder %s3547_s15, %s3604_s6 }
 0x2d5   : > { %p2502_p1 = scmp.lt.u32.totalorder %s2500_s11, %s2496_s19  ;;  %p2504_p6 = scmp.lt.u32.totalorder %s2496_s19, %s3547_s15 }
 0x2d6   : > { %p2498_p5 = pnand %p2497_p4, %p3615_p11 }
 0x2d7   : > { %p2503_p3 = por %p2502_p1, %p2501_p9 }
 0x2d8   : > { %p2499_p7 = pneg %p2498_p5 }
 0x2d9   : > { %p2505_p12 = por %p2504_p6, %p2503_p3 }
 0x2db   : > { %p2506_p13 = pnand %p2505_p12, %p2499_p7 }
 0x2dd   : > { %2509 = shalt.err (!%p2506_p13)
}
 0x2de   : > { %s2556_s17 = smov 128   ;;  %s2557_s28 = smov 8  }
 0x2df   : > { %2186 = dma.vmem_to_hbm [thread:$0]  (%p3615_p11), %s3549_s18, 2048, %s3547_s15, %s1930_s25, %s2556_s17, %s2556_s17, %s2557_s28  }
 0x2e0 PF: > { %s1958_s12 = sand.u32 1, %s2536_s21   ;;  %p3616_p8 = scmp.ne.s32.totalorder %s3609_s10, 0 }
 0x2e1   : > { %p3617_p10 = scmp.ge.s32.totalorder %s2548_s24, 2  ;;  %s1959_s26 = scalar_lea.sflag [#allocation4], %s1958_s12 }
 0x2e3   : > { %p2193_p0 = pnand %p3617_p10, %p3616_p8 }
 0x2e5   : > { %2531 = dma.done.wait (!%p2193_p0), %s1959_s26, 2048  }
 0x2e6   : > { %2533 = vsyncadd (!%p2193_p0), %s1959_s26, 4294965248  ;;  %p19_p2 = scmp.ge.s32.totalorder %s2618_s27, 4   ;;  %s3618_s21 = smov %s2540_s22 }
 0x2e7   : > { %s3619_s22 = smov %s2544_s23  ;;  %s3620_s23 = smov %s2630_s30 }
 0x2e8   : > { %s3621_s24 = smov %s2618_s27  ;;  %21 = sbr.rel (!%p19_p2) target bundleno = 5 (0x5), region = 92 }
 0x2ef   :  { %1964 = vsyncpa [#allocation3], 1 }
 0x2f0   :  { %1966 = vsyncpa [#allocation3 + $0x1], 1 }
 0x2f1   :  { %1967 = vsyncpa [#allocation4], 1 }
 0x2f2   :  { %1969 = vsyncpa [#allocation4 + $0x1], 1 }

</bundles_post_ra>
